<compile_context>
chip_gen: v7x
topology: tpu7x:2x2x1
jax: 0.10.0
libtpu: 0.0.40
codegen_flags: <defaults>
</compile_context>

<pallas_src>
import numpy as np
import jax
import jax.numpy as jnp
from jax.experimental import pallas as pl
from jax.experimental.pallas import tpu as pltpu


_TWO_OVER_PI = 0.6366197723675814
_PI_OVER_2 = 1.5707963267948966


# ------------------------------ Pallas kernel ------------------------------ #
def _sine_fan_kernel(x_ref, w_ref, b_ref, sin_ref, cos_ref):
    # x_ref : (tm, 2) f32 — tile of flattened points
    # w_ref : (2, n)  f32 — (radius*direction)^T, PRE-SCALED by 2/pi
    # b_ref : (1, n)  f32 — phase, PRE-SCALED by 2/pi
    #
    # VPU broadcast FMA instead of an MXU matmul (K=2).
    x0 = x_ref[:, 0:1]          # (tm, 1)
    x1 = x_ref[:, 1:2]          # (tm, 1)
    w0 = w_ref[0:1, :]          # (1, n)
    w1 = w_ref[1:2, :]          # (1, n)
    o2 = x0 * w0 + x1 * w1 + b_ref[...]      # (tm, n) == o * 2/pi

    # Range reduction: o = k*(pi/2) + r, |r| <= pi/4. (o2 - k) is Sterbenz-exact.
    k = jnp.round(o2)
    r = (o2 - k) * _PI_OVER_2
    r2 = r * r

    # sin(r) to r^7 on [-pi/4, pi/4] (truncation error < ~4e-7).
    s_val = r * (1.0 + r2 * (-1.6666667e-01
                 + r2 * (8.3333333e-03 + r2 * (-1.9841270e-04))))
    # cos(r) = sqrt(1 - sin^2(r)) — safe (cos(r) >= 1/sqrt(2) > 0); sqrt is EUP work.
    c_val = jnp.sqrt(1.0 - s_val * s_val)

    # Quadrant q = k mod 4 via int bit tricks (two's complement handles k < 0):
    #   q odd            -> swap sin/cos magnitudes
    #   q in {2,3}       -> negate sin   (bit: ki & 2)
    #   q in {1,2}       -> negate cos   (bit: (ki+1) & 2)
    ki = k.astype(jnp.int32)
    swap = (ki & 1) != 0
    sin_mag = jnp.where(swap, c_val, s_val)
    cos_mag = jnp.where(swap, s_val, c_val)
    sin_flip = (ki & 2) << 30                  # 0 or 0x80000000 (sign-bit mask)
    cos_flip = ((ki + 1) & 2) << 30
    sin_o = pltpu.bitcast(pltpu.bitcast(sin_mag, jnp.int32) ^ sin_flip, jnp.float32)
    cos_o = pltpu.bitcast(pltpu.bitcast(cos_mag, jnp.int32) ^ cos_flip, jnp.float32)

    # Cast only at the store (outputs may be bf16; math stays f32).
    sin_ref[...] = sin_o.astype(sin_ref.dtype)
    cos_ref[...] = cos_o.astype(cos_ref.dtype)


# ------------------------------ host wrapper ------------------------------- #
def _round_up(a, b):
    return (a + b - 1) // b * b


def _vmem_capacity_bytes():
    try:
        return int(pltpu.get_tpu_info().vmem_capacity_bytes)
    except Exception:
        return 64 << 20   # conservative: assume the smallest (v7x) VMEM


def _footprint_bytes(tm, n, out_bytes):
    # Double-buffered pipeline footprint:
    #   2 outputs x 2 buffers x (tm, n)
    #   x tile (tm, 2) lane-padded to 128 lanes, x 2 buffers
    #   resident w (2->8 sublanes, n) + phase (1->8, n), x 2 buffers
    outs = 2 * 2 * tm * n * out_bytes
    x_in = 2 * tm * 128 * 4
    wres = 2 * 2 * 8 * n * 4
    return outs + x_in + wres


def subband_sine_2dfan_forward(x, w, phase, *, tm=None, out_dtype=jnp.float32):
    """x: (bs, npts, 2); w: (n, 2); phase: (n,). Returns (sinx, cosx), each (bs, npts, n)."""
    bs, npts, two = x.shape
    assert two == 2
    n = w.shape[0]
    # Lane-dense output stores (documented largest single out_spec lever).
    assert n % 128 == 0, "hidden dim n must be a multiple of 128"
    M = bs * npts
    out_bytes = jnp.dtype(out_dtype).itemsize

    # --- generation-aware VMEM budget ---
    cap_bytes = _vmem_capacity_bytes()
    footprint_cap = (72 << 20) if cap_bytes >= (96 << 20) else (26 << 20)

    # --- tile-size selection ---
    #  * each grid step should produce >= ~256K output elements so the
    #    ~0.35us per-step pipeline overhead stays < ~10%
    #  * shrink only if the double-buffered footprint exceeds the cap
    #  * never larger than the (8-aligned) problem itself
    if tm is None:
        target_elems = 256 * 1024
        tm = max(256, _round_up(pl.cdiv(target_elems, n), 256))
        while tm > 8 and _footprint_bytes(tm, n, out_bytes) > footprint_cap:
            tm //= 2
        tm = min(tm, max(8, _round_up(M, 8)))
    assert tm % 8 == 0

    grid = (pl.cdiv(M, tm),)   # no host pad; Pallas masks the partial last block

    x_flat = x.reshape(M, 2).astype(jnp.float32)
    # Pre-scale the (tiny) parameters by 2/pi so the kernel's range reduction
    # is just round / subtract / one multiply.
    w_t = jnp.transpose(w).astype(jnp.float32) * np.float32(_TWO_OVER_PI)   # (2, n)
    b2d = phase.reshape(1, n).astype(jnp.float32) * np.float32(_TWO_OVER_PI)

    footprint = _footprint_bytes(tm, n, out_bytes)
    vmem_limit = int(max(24 << 20,
                         min(footprint + (8 << 20), footprint_cap + (12 << 20))))

    cost = pl.CostEstimate(
        flops=30 * M * n,          # VPU polynomial + FMA + quadrant work
        transcendentals=M * n,     # one EUP sqrt per output element
        bytes_accessed=2 * M * n * out_bytes + M * 8 + 12 * n,
    )

    out_shape = (
        jax.ShapeDtypeStruct((M, n), out_dtype),
        jax.ShapeDtypeStruct((M, n), out_dtype),
    )

    # TODO(synk): on v7x, verify the M axis actually shards across both
    # TensorCores under "parallel"; if not, switch to pltpu.CORE_PARALLEL.
    sin_flat, cos_flat = pl.pallas_call(
        _sine_fan_kernel,
        out_shape=out_shape,
        grid_spec=pltpu.PrefetchScalarGridSpec(
            num_scalar_prefetch=0,
            grid=grid,
            in_specs=[
                pl.BlockSpec((tm, 2), lambda i: (i, 0)),   # x tile
                pl.BlockSpec((2, n), lambda i: (0, 0)),    # full weight, resident
                pl.BlockSpec((1, n), lambda i: (0, 0)),    # full phase, resident
            ],
            out_specs=[
                pl.BlockSpec((tm, n), lambda i: (i, 0)),
                pl.BlockSpec((tm, n), lambda i: (i, 0)),
            ],
        ),
        compiler_params=pltpu.CompilerParams(
            dimension_semantics=("parallel",),
            vmem_limit_bytes=vmem_limit,
        ),
        cost_estimate=cost,
    )(x_flat, w_t, b2d)

    return sin_flat.reshape(bs, npts, n), cos_flat.reshape(bs, npts, n)


# -------------------------- parameter construction ------------------------- #
def init_params(key, lr, ur, la, ua, nsmp, quantize=False, fan_uniform=False):
    """Deterministic re-implementation of SubbandSine2DFAN.__init__ + _get_freq_."""
    k_r, k_a, k_p = jax.random.split(key, 3)
    R1 = np.pi * lr
    R2 = np.pi * ur
    u_r = jax.random.uniform(k_r, (nsmp,), dtype=jnp.float32)
    if fan_uniform:
        radius = jnp.sqrt(u_r) * (R2 - R1) + R1
    else:
        radius = u_r * (R2 - R1) + R1
    angles = jax.random.uniform(k_a, (nsmp,), dtype=jnp.float32) * (ua - la) + la
    phase = (jax.random.uniform(k_p, (nsmp,), dtype=jnp.float32) - 0.5) * 2.0 * np.pi

    # _get_freq_: w = radius * [cos(angle), sin(angle)]  -> (n, 2)
    direction = jnp.stack([jnp.cos(angles), jnp.sin(angles)], axis=-1)
    w = radius[:, None] * direction
    if quantize:
        w = jnp.round(w / np.pi / 2.0) * np.pi * 2.0
    return w, phase


# ---------------------------------- main ------------------------------------ #
if __name__ == "__main__":
    key = jax.random.PRNGKey(0)
    k_param, k_x1, k_x2 = jax.random.split(key, 3)

    # Module hyper-params (small, forward-consistent shapes).
    lr, ur = 1, 4                 # radial band [pi*lr, pi*ur]
    la, ua = 0.0, np.pi           # angular band
    nsmp = 128                    # hidden dim (lane-dense)
    bs, npts = 2, 128             # bs*npts = 256 points

    w, phase = init_params(k_param, lr, ur, la, ua, nsmp,
                           quantize=False, fan_uniform=False)

    # x in [-1, 1], shape (bs, npts, 2)
    x = jax.random.uniform(k_x1, (bs, npts, 2), dtype=jnp.float32,
                           minval=-1.0, maxval=1.0)

    sinx, cosx = subband_sine_2dfan_forward(x, w, phase)
    sinx = jax.block_until_ready(sinx)
    cosx = jax.block_until_ready(cosx)

    # Pure-JAX reference check of the forward semantics.
    o_ref = jnp.einsum("bpd,nd->bpn", x, w) + phase[None, None, :]
    sin_ref = jnp.sin(o_ref)
    cos_ref = jnp.cos(o_ref)
    assert sinx.shape == (bs, npts, nsmp) and cosx.shape == (bs, npts, nsmp)
    np.testing.assert_allclose(np.asarray(sinx), np.asarray(sin_ref),
                               rtol=3e-5, atol=3e-5)
    np.testing.assert_allclose(np.asarray(cosx), np.asarray(cos_ref),
                               rtol=3e-5, atol=3e-5)

    # Ragged-M case: M not a multiple of tm exercises the masked partial last
    # block (no host pad, no output slice).
    bs2, npts2 = 3, 100           # M = 300
    x2 = jax.random.uniform(k_x2, (bs2, npts2, 2), dtype=jnp.float32,
                            minval=-1.0, maxval=1.0)
    sinx2, cosx2 = subband_sine_2dfan_forward(x2, w, phase, tm=64)
    sinx2 = jax.block_until_ready(sinx2)
    cosx2 = jax.block_until_ready(cosx2)
    o_ref2 = jnp.einsum("bpd,nd->bpn", x2, w) + phase[None, None, :]
    np.testing.assert_allclose(np.asarray(sinx2), np.asarray(jnp.sin(o_ref2)),
                               rtol=3e-5, atol=3e-5)
    np.testing.assert_allclose(np.asarray(cosx2), np.asarray(jnp.cos(o_ref2)),
                               rtol=3e-5, atol=3e-5)

    # Optional bf16-output variant (halves HBM writeback when bandwidth-bound,
    # e.g. v5e with f32 outputs).
    sinx_bf, cosx_bf = subband_sine_2dfan_forward(x, w, phase,
                                                  out_dtype=jnp.bfloat16)
    sinx_bf = jax.block_until_ready(sinx_bf)
    cosx_bf = jax.block_until_ready(cosx_bf)
    np.testing.assert_allclose(np.asarray(sinx_bf, dtype=np.float32),
                               np.asarray(sin_ref), rtol=2e-2, atol=2e-2)
    np.testing.assert_allclose(np.asarray(cosx_bf, dtype=np.float32),
                               np.asarray(cos_ref), rtol=2e-2, atol=2e-2)

    print("KERNEL_OK")
</pallas_src>

<mosaic_0001>
module attributes {stable_mosaic.version = 11 : i64} {
  func.func @_sine_fan_kernel(%arg0: i32, %arg1: memref<256x2xf32, #tpu.memory_space<vmem>>, %arg2: memref<2x128xf32, #tpu.memory_space<vmem>>, %arg3: memref<1x128xf32, #tpu.memory_space<vmem>>, %arg4: memref<256x128xf32, #tpu.memory_space<vmem>>, %arg5: memref<256x128xf32, #tpu.memory_space<vmem>>) attributes {dimension_semantics = [#tpu.dimension_semantics<parallel>], iteration_bounds = array<i64: 1>, scalar_prefetch = 0 : i64, scratch_operands = 0 : i64, tpu.core_type = #tpu.core_type<tc>, window_params = [{transform_indices = @transform_0, window_bounds = array<i64: 256, 2>}, {pipeline_mode = #tpu.pipeline_mode<synchronous>, transform_indices = @transform_1, window_bounds = array<i64: 2, 128>}, {pipeline_mode = #tpu.pipeline_mode<synchronous>, transform_indices = @transform_2, window_bounds = array<i64: 1, 128>}, {transform_indices = @transform_3, window_bounds = array<i64: 256, 128>}, {transform_indices = @transform_4, window_bounds = array<i64: 256, 128>}]} {
    %c0 = arith.constant 0 : index
    %c0_0 = arith.constant 0 : index
    %0 = vector.load %arg1[%c0, %c0_0] : memref<256x2xf32, #tpu.memory_space<vmem>>, vector<256x1xf32>
    %c0_1 = arith.constant 0 : index
    %c1 = arith.constant 1 : index
    %1 = vector.load %arg1[%c0_1, %c1] : memref<256x2xf32, #tpu.memory_space<vmem>>, vector<256x1xf32>
    %c0_2 = arith.constant 0 : index
    %c0_3 = arith.constant 0 : index
    %2 = vector.load %arg2[%c0_2, %c0_3] : memref<2x128xf32, #tpu.memory_space<vmem>>, vector<1x128xf32>
    %c1_4 = arith.constant 1 : index
    %c0_5 = arith.constant 0 : index
    %3 = vector.load %arg2[%c1_4, %c0_5] : memref<2x128xf32, #tpu.memory_space<vmem>>, vector<1x128xf32>
    %4 = vector.broadcast %0 : vector<256x1xf32> to vector<256x128xf32>
    %5 = vector.broadcast %2 : vector<1x128xf32> to vector<256x128xf32>
    %6 = arith.mulf %4, %5 : vector<256x128xf32>
    %7 = vector.broadcast %1 : vector<256x1xf32> to vector<256x128xf32>
    %8 = vector.broadcast %3 : vector<1x128xf32> to vector<256x128xf32>
    %9 = arith.mulf %7, %8 : vector<256x128xf32>
    %10 = arith.addf %6, %9 : vector<256x128xf32>
    %c0_6 = arith.constant 0 : index
    %c0_7 = arith.constant 0 : index
    %11 = vector.load %arg3[%c0_6, %c0_7] : memref<1x128xf32, #tpu.memory_space<vmem>>, vector<1x128xf32>
    %12 = vector.broadcast %11 : vector<1x128xf32> to vector<256x128xf32>
    %13 = arith.addf %10, %12 : vector<256x128xf32>
    %14 = math.roundeven %13 : vector<256x128xf32>
    %15 = arith.subf %13, %14 : vector<256x128xf32>
    %cst = arith.constant 1.57079637 : f32
    %16 = vector.broadcast %cst : f32 to vector<256x128xf32>
    %17 = arith.mulf %15, %16 : vector<256x128xf32>
    %18 = arith.mulf %17, %17 : vector<256x128xf32>
    %cst_8 = arith.constant -1.98412701E-4 : f32
    %19 = vector.broadcast %cst_8 : f32 to vector<256x128xf32>
    %20 = arith.mulf %18, %19 : vector<256x128xf32>
    %cst_9 = arith.constant 0.00833333284 : f32
    %21 = vector.broadcast %cst_9 : f32 to vector<256x128xf32>
    %22 = arith.addf %21, %20 : vector<256x128xf32>
    %23 = arith.mulf %18, %22 : vector<256x128xf32>
    %cst_10 = arith.constant -0.166666672 : f32
    %24 = vector.broadcast %cst_10 : f32 to vector<256x128xf32>
    %25 = arith.addf %24, %23 : vector<256x128xf32>
    %26 = arith.mulf %18, %25 : vector<256x128xf32>
    %cst_11 = arith.constant 1.000000e+00 : f32
    %27 = vector.broadcast %cst_11 : f32 to vector<256x128xf32>
    %28 = arith.addf %27, %26 : vector<256x128xf32>
    %29 = arith.mulf %17, %28 : vector<256x128xf32>
    %30 = arith.mulf %29, %29 : vector<256x128xf32>
    %cst_12 = arith.constant 1.000000e+00 : f32
    %31 = vector.broadcast %cst_12 : f32 to vector<256x128xf32>
    %32 = arith.subf %31, %30 : vector<256x128xf32>
    %33 = math.sqrt %32 : vector<256x128xf32>
    %34 = arith.fptosi %14 : vector<256x128xf32> to vector<256x128xi32>
    %c1_i32 = arith.constant 1 : i32
    %35 = vector.broadcast %c1_i32 : i32 to vector<256x128xi32>
    %36 = arith.andi %34, %35 : vector<256x128xi32>
    %c0_i32 = arith.constant 0 : i32
    %37 = vector.broadcast %c0_i32 : i32 to vector<256x128xi32>
    %38 = arith.cmpi ne, %36, %37 : vector<256x128xi32>
    %39 = arith.select %38, %33, %29 : vector<256x128xi1>, vector<256x128xf32>
    %40 = arith.select %38, %29, %33 : vector<256x128xi1>, vector<256x128xf32>
    %c2_i32 = arith.constant 2 : i32
    %41 = vector.broadcast %c2_i32 : i32 to vector<256x128xi32>
    %42 = arith.andi %34, %41 : vector<256x128xi32>
    %c30_i32 = arith.constant 30 : i32
    %43 = vector.broadcast %c30_i32 : i32 to vector<256x128xi32>
    %44 = arith.shli %42, %43 : vector<256x128xi32>
    %c1_i32_13 = arith.constant 1 : i32
    %45 = vector.broadcast %c1_i32_13 : i32 to vector<256x128xi32>
    %46 = arith.addi %34, %45 : vector<256x128xi32>
    %c2_i32_14 = arith.constant 2 : i32
    %47 = vector.broadcast %c2_i32_14 : i32 to vector<256x128xi32>
    %48 = arith.andi %46, %47 : vector<256x128xi32>
    %c30_i32_15 = arith.constant 30 : i32
    %49 = vector.broadcast %c30_i32_15 : i32 to vector<256x128xi32>
    %50 = arith.shli %48, %49 : vector<256x128xi32>
    %51 = tpu.bitcast %39 : vector<256x128xf32> -> vector<256x128xi32>
    %52 = arith.xori %51, %44 : vector<256x128xi32>
    %53 = tpu.bitcast %52 : vector<256x128xi32> -> vector<256x128xf32>
    %54 = tpu.bitcast %40 : vector<256x128xf32> -> vector<256x128xi32>
    %55 = arith.xori %54, %50 : vector<256x128xi32>
    %56 = tpu.bitcast %55 : vector<256x128xi32> -> vector<256x128xf32>
    %c0_16 = arith.constant 0 : index
    %c0_17 = arith.constant 0 : index
    %57 = vector.load %arg4[%c0_16, %c0_17] : memref<256x128xf32, #tpu.memory_space<vmem>>, vector<256x128xf32>
    tpu.vector_store %arg4[%c0_16, %c0_17], %53 {strides = array<i32>} : memref<256x128xf32, #tpu.memory_space<vmem>>, vector<256x128xf32>,
    %c0_18 = arith.constant 0 : index
    %c0_19 = arith.constant 0 : index
    %58 = vector.load %arg5[%c0_18, %c0_19] : memref<256x128xf32, #tpu.memory_space<vmem>>, vector<256x128xf32>
    tpu.vector_store %arg5[%c0_18, %c0_19], %56 {strides = array<i32>} : memref<256x128xf32, #tpu.memory_space<vmem>>, vector<256x128xf32>,
    return
  }
  func.func @transform_0(%arg0: i32) -> (i32, i32) {
    %c0_i32 = arith.constant 0 : i32
    %c0_i32_0 = arith.constant 0 : i32
    return %arg0, %c0_i32 : i32, i32
  }
  func.func @transform_1(%arg0: i32) -> (i32, i32) {
    %c0_i32 = arith.constant 0 : i32
    %c0_i32_0 = arith.constant 0 : i32
    %c0_i32_1 = arith.constant 0 : i32
    return %c0_i32, %c0_i32_0 : i32, i32
  }
  func.func @transform_2(%arg0: i32) -> (i32, i32) {
    %c0_i32 = arith.constant 0 : i32
    %c0_i32_0 = arith.constant 0 : i32
    %c0_i32_1 = arith.constant 0 : i32
    return %c0_i32, %c0_i32_0 : i32, i32
  }
  func.func @transform_3(%arg0: i32) -> (i32, i32) {
    %c0_i32 = arith.constant 0 : i32
    %c0_i32_0 = arith.constant 0 : i32
    return %arg0, %c0_i32 : i32, i32
  }
  func.func @transform_4(%arg0: i32) -> (i32, i32) {
    %c0_i32 = arith.constant 0 : i32
    %c0_i32_0 = arith.constant 0 : i32
    return %arg0, %c0_i32 : i32, i32
  }
}

</mosaic_0001>

<bundles_post_ra>
// kernel: tpu_custom_call.1
= control target key start
LH: loop header
LB: loop body
LE: loop exit
PB: predicated region body
PF: predicated region fallthrough
CT: control target
= control target key end

     0   :  { %10 = vsyncpa [#allocation3], 0  ;;  %v1988_v2 = vmov 0   ;;  %s3507_s0 = inlined_call_operand.vmem [shape: f32[256,2], index: 0, kind: input, shape index: {}]   ;;  %s3508_s1 = inlined_call_operand.vmem [shape: f32[2,128], index: 1, kind: input, shape index: {}]   ;;  %s3509_s2 = inlined_call_operand.vmem [shape: f32[1,128], index: 2, kind: input, shape index: {}]   ;;  %s3510_s3 = inlined_call_operand.hbm [shape: f32[256,128], index: 3, kind: output, shape index: {0}]   ;;  %s3511_s4 = inlined_call_operand.hbm [shape: f32[256,128], index: 4, kind: output, shape index: {1}]  }
   0x1   :  { %v2022_v0 = vld [vmem:[%s3507_s0 + $0x10] sm:$0xff]  ;;  %v2027_v1 = vld [vmem:[%s3507_s0] sm:$0xff]  ;;  %1869 = vset.pattern.permute.xlu1 %v1988_v2  ;;  %1868 = vset.pattern.permute.xlu0 %v1988_v2  ;;  %v2034_v3 = vld [vmem:[%s3507_s0 + $0x18] sm:$0xff] }
   0x2   :  { %64 = vperm.xlu1 %1869, %v2022_v0   ;;  %54 = vperm.xlu0 %1868, %v2027_v1   ;;  %v19_v4 = vld [vmem:[%s3507_s0 + $0x8] sm:$0xff]  ;;  %v22_v6 = vld [vmem:[%s3507_s0 + $0x20] sm:$0xff]  ;;  %v25_v7 = vld [vmem:[%s3507_s0 + $0x38] sm:$0xff] }
   0x3   :  { %v2043_v5 = vld [vmem:[%s3507_s0 + $0x28] sm:$0xff]  ;;  %v24_v8 = vld [vmem:[%s3507_s0 + $0x30] sm:$0xff] }
   0x6   :  { %69 = vperm.xlu1 %1869, %v2034_v3   ;;  %59 = vperm.xlu0 %1868, %v19_v4  }
   0xa   :  { %79 = vperm.xlu1 %1869, %v2043_v5   ;;  %74 = vperm.xlu0 %1868, %v22_v6  }
   0xb   :  { %11 = vsyncpa [#allocation5], 0  ;;  %v27_v9 = vld [vmem:[%s3507_s0 + $0x48] sm:$0xff]  ;;  %v26_v10 = vld [vmem:[%s3507_s0 + $0x40] sm:$0xff]  ;;  %v1989_v33 = vmov 1   ;;  %s1991_s14 = smov [#allocation4]  }
   0xc   :  { %v29_v11 = vld [vmem:[%s3507_s0 + $0x58] sm:$0xff]  ;;  %v28_v12 = vld [vmem:[%s3507_s0 + $0x50] sm:$0xff]  ;;  %v31_v13 = vld [vmem:[%s3507_s0 + $0x68] sm:$0xff]  ;;  %s1716_s15 = sshll.u32 %s1991_s14, 4  ;;  %s3476_s15 = int_to_ptr.vmem [resolvable:$true] %s1716_s15 }
   0xd   :  { %v30_v14 = vld [vmem:[%s3507_s0 + $0x60] sm:$0xff]  ;;  %v33_v15 = vld [vmem:[%s3507_s0 + $0x78] sm:$0xff]  ;;  %v32_v16 = vld [vmem:[%s3507_s0 + $0x70] sm:$0xff] }
   0xe   :  { %89 = vperm.xlu1 %1869, %v25_v7   ;;  %84 = vperm.xlu0 %1868, %v24_v8   ;;  %v35_v17 = vld [vmem:[%s3507_s0 + $0x88] sm:$0xff]  ;;  %v34_v18 = vld [vmem:[%s3507_s0 + $0x80] sm:$0xff]  ;;  %v37_v19 = vld [vmem:[%s3507_s0 + $0x98] sm:$0xff] }
   0xf   :  { %v36_v20 = vld [vmem:[%s3507_s0 + $0x90] sm:$0xff]  ;;  %v39_v21 = vld [vmem:[%s3507_s0 + $0xa8] sm:$0xff]  ;;  %v38_v22 = vld [vmem:[%s3507_s0 + $0xa0] sm:$0xff] }
  0x10   :  { %v41_v23 = vld [vmem:[%s3507_s0 + $0xb8] sm:$0xff]  ;;  %v40_v24 = vld [vmem:[%s3507_s0 + $0xb0] sm:$0xff]  ;;  %v43_v25 = vld [vmem:[%s3507_s0 + $0xc8] sm:$0xff] }
  0x11   :  { %v42_v26 = vld [vmem:[%s3507_s0 + $0xc0] sm:$0xff]  ;;  %v45_v27 = vld [vmem:[%s3507_s0 + $0xd8] sm:$0xff]  ;;  %v44_v28 = vld [vmem:[%s3507_s0 + $0xd0] sm:$0xff] }
  0x12   :  { %99 = vperm.xlu1 %1869, %v27_v9   ;;  %94 = vperm.xlu0 %1868, %v26_v10   ;;  %v47_v29 = vld [vmem:[%s3507_s0 + $0xe8] sm:$0xff]  ;;  %v46_v30 = vld [vmem:[%s3507_s0 + $0xe0] sm:$0xff]  ;;  %v49_v31 = vld [vmem:[%s3507_s0 + $0xf8] sm:$0xff] }
  0x13   :  { %v48_v32 = vld [vmem:[%s3507_s0 + $0xf0] sm:$0xff]  ;;  %v2146_v42 = vld [vmem:[%s3508_s1] ss:$0 sm:$0xff] }
  0x16   :  { %109 = vperm.xlu1 %1869, %v29_v11   ;;  %104 = vperm.xlu0 %1868, %v28_v12  }
  0x1a   :  { %119 = vperm.xlu1 %1869, %v31_v13   ;;  %114 = vperm.xlu0 %1868, %v30_v14  }
  0x1e   :  { %129 = vperm.xlu1 %1869, %v33_v15   ;;  %124 = vperm.xlu0 %1868, %v32_v16  }
  0x22   :  { %139 = vperm.xlu1 %1869, %v35_v17   ;;  %134 = vperm.xlu0 %1868, %v34_v18  }
  0x26   :  { %149 = vperm.xlu1 %1869, %v37_v19   ;;  %144 = vperm.xlu0 %1868, %v36_v20  }
  0x2a   :  { %159 = vperm.xlu1 %1869, %v39_v21   ;;  %154 = vperm.xlu0 %1868, %v38_v22  }
  0x2e   :  { %169 = vperm.xlu1 %1869, %v41_v23   ;;  %164 = vperm.xlu0 %1868, %v40_v24  }
  0x32   :  { %179 = vperm.xlu1 %1869, %v43_v25   ;;  %174 = vperm.xlu0 %1868, %v42_v26  }
  0x36   :  { %189 = vperm.xlu1 %1869, %v45_v27   ;;  %184 = vperm.xlu0 %1868, %v44_v28  }
  0x3a   :  { %199 = vperm.xlu1 %1869, %v47_v29   ;;  %194 = vperm.xlu0 %1868, %v46_v30  }
  0x3e   :  { %209 = vperm.xlu1 %1869, %v49_v31   ;;  %204 = vperm.xlu0 %1868, %v48_v32  }
  0x42   :  { %1871 = vset.pattern.permute.xlu1 %v1989_v33  ;;  %1870 = vset.pattern.permute.xlu0 %v1989_v33  ;;  %v2231_v33 = vld [vmem:[%s3509_s2] ss:$0 sm:$0xff] }
  0x43   :  { %253 = vperm.xlu1 %1871, %v19_v4   ;;  %249 = vperm.xlu0 %1870, %v2027_v1  }
  0x47   :  { %257 = vperm.xlu1 %1871, %v2022_v0   ;;  %261 = vperm.xlu0 %1870, %v2034_v3  }
  0x4b   :  { %265 = vperm.xlu1 %1871, %v22_v6   ;;  %269 = vperm.xlu0 %1870, %v2043_v5  }
  0x4f   :  { %273 = vperm.xlu1 %1871, %v24_v8   ;;  %277 = vperm.xlu0 %1870, %v25_v7  }
  0x53   :  { %281 = vperm.xlu1 %1871, %v26_v10   ;;  %285 = vperm.xlu0 %1870, %v27_v9  }
  0x57   :  { %289 = vperm.xlu1 %1871, %v28_v12   ;;  %293 = vperm.xlu0 %1870, %v29_v11  }
  0x5b   :  { %297 = vperm.xlu1 %1871, %v30_v14   ;;  %301 = vperm.xlu0 %1870, %v31_v13  }
  0x5f   :  { %305 = vperm.xlu1 %1871, %v32_v16   ;;  %309 = vperm.xlu0 %1870, %v33_v15  }
  0x63   :  { %313 = vperm.xlu1 %1871, %v34_v18   ;;  %317 = vperm.xlu0 %1870, %v35_v17  }
  0x67   :  { %321 = vperm.xlu1 %1871, %v36_v20   ;;  %325 = vperm.xlu0 %1870, %v37_v19  }
  0x6b   :  { %329 = vperm.xlu1 %1871, %v38_v22   ;;  %333 = vperm.xlu0 %1870, %v39_v21  }
  0x6f   :  { %337 = vperm.xlu1 %1871, %v40_v24   ;;  %341 = vperm.xlu0 %1870, %v41_v23  }
  0x73   :  { %345 = vperm.xlu1 %1871, %v42_v26   ;;  %349 = vperm.xlu0 %1870, %v43_v25   ;;  %v2222_v26 = vld [vmem:[%s3508_s1 + $0x1] ss:$0 sm:$0xff] }
  0x77   :  { %353 = vperm.xlu1 %1871, %v44_v28   ;;  %357 = vperm.xlu0 %1870, %v45_v27  }
  0x7b   :  { %361 = vperm.xlu1 %1871, %v46_v30   ;;  %365 = vperm.xlu0 %1870, %v47_v29  }
  0x7f   :  { %369 = vperm.xlu1 %1871, %v48_v32   ;;  %373 = vperm.xlu0 %1870, %v49_v31  }
  0x81   :  { %v2131_v34 = vpop.permute.xlu1 %64  ;;  %v55_v35 = vpop.permute.xlu0 %54 }
  0x82   :  { %v216_v29 = vmul.f32 %v2146_v42, %v55_v35 }
  0x85   :  { %v2133_v36 = vpop.permute.xlu1 %69  ;;  %v60_v37 = vpop.permute.xlu0 %59 }
  0x86   :  { %v217_v30 = vmul.f32 %v2146_v42, %v60_v37 }
  0x89   :  { %v2135_v38 = vpop.permute.xlu1 %79  ;;  %v2137_v39 = vpop.permute.xlu0 %74 }
  0x8d   :  { %v2139_v40 = vpop.permute.xlu1 %89  ;;  %v2141_v41 = vpop.permute.xlu0 %84 }
  0x91   :  { %v100_v43 = vpop.permute.xlu1 %99  ;;  %v2148_v44 = vpop.permute.xlu0 %94 }
  0x92   :  { %v2151_v45 = vmul.f32 %v2146_v42, %v100_v43 }
  0x95   :  { %v110_v46 = vpop.permute.xlu1 %109  ;;  %v105_v47 = vpop.permute.xlu0 %104 }
  0x96   :  { %v2154_v48 = vmul.f32 %v2146_v42, %v110_v46  ;;  %v2157_v49 = vmul.f32 %v2146_v42, %v105_v47 }
  0x99   :  { %v120_v50 = vpop.permute.xlu1 %119  ;;  %v115_v51 = vpop.permute.xlu0 %114 }
  0x9a   :  { %v2160_v52 = vmul.f32 %v2146_v42, %v120_v50  ;;  %v2163_v53 = vmul.f32 %v2146_v42, %v115_v51 }
  0x9d   :  { %v130_v54 = vpop.permute.xlu1 %129  ;;  %v125_v55 = vpop.permute.xlu0 %124 }
  0x9e   :  { %v2166_v56 = vmul.f32 %v2146_v42, %v130_v54  ;;  %v2169_v57 = vmul.f32 %v2146_v42, %v125_v55  ;;  %v218_v55 = vmul.f32 %v2146_v42, %v2131_v34 }
  0xa1   :  { %v140_v58 = vpop.permute.xlu1 %139  ;;  %v135_v59 = vpop.permute.xlu0 %134 }
  0xa2   :  { %v2172_v60 = vmul.f32 %v2146_v42, %v140_v58  ;;  %v2175_v61 = vmul.f32 %v2146_v42, %v135_v59  ;;  %v219_v58 = vmul.f32 %v2146_v42, %v2133_v36 }
  0xa5   :  { %v150_v62 = vpop.permute.xlu1 %149  ;;  %v145_v63 = vpop.permute.xlu0 %144 }
  0xa6   :  { %v2178_v0 = vmul.f32 %v2146_v42, %v150_v62  ;;  %v2181_v1 = vmul.f32 %v2146_v42, %v145_v63 }
  0xa9   :  { %v160_v2 = vpop.permute.xlu1 %159  ;;  %v155_v3 = vpop.permute.xlu0 %154 }
  0xaa   :  { %v2184_v4 = vmul.f32 %v2146_v42, %v160_v2  ;;  %v2187_v5 = vmul.f32 %v2146_v42, %v155_v3 }
  0xad   :  { %v170_v6 = vpop.permute.xlu1 %169  ;;  %v165_v7 = vpop.permute.xlu0 %164 }
  0xae   :  { %v2190_v8 = vmul.f32 %v2146_v42, %v170_v6  ;;  %v2193_v9 = vmul.f32 %v2146_v42, %v165_v7 }
  0xb0   :  { %3512 = vst [vmem:[#allocation8_spill] sm:$0xff] %v2190_v8 }
  0xb1   :  { %v180_v10 = vpop.permute.xlu1 %179  ;;  %v175_v11 = vpop.permute.xlu0 %174 }
  0xb2   :  { %v2196_v12 = vmul.f32 %v2146_v42, %v180_v10  ;;  %v2199_v13 = vmul.f32 %v2146_v42, %v175_v11 }
  0xb4   :  { %3513 = vst [vmem:[#allocation9_spill] sm:$0xff] %v2196_v12  ;;  %3514 = vst [vmem:[#allocation10_spill] sm:$0xff] %v2199_v13 }
  0xb5   :  { %v190_v14 = vpop.permute.xlu1 %189  ;;  %v185_v15 = vpop.permute.xlu0 %184 }
  0xb6   :  { %v2202_v16 = vmul.f32 %v2146_v42, %v190_v14  ;;  %v2205_v17 = vmul.f32 %v2146_v42, %v185_v15 }
  0xb8   :  { %3515 = vst [vmem:[#allocation11_spill] sm:$0xff] %v2202_v16  ;;  %3516 = vst [vmem:[#allocation12_spill] sm:$0xff] %v2205_v17 }
  0xb9   :  { %v200_v18 = vpop.permute.xlu1 %199  ;;  %v195_v19 = vpop.permute.xlu0 %194 }
  0xba   :  { %v2208_v20 = vmul.f32 %v2146_v42, %v200_v18  ;;  %v2211_v21 = vmul.f32 %v2146_v42, %v195_v19 }
  0xbc   :  { %3517 = vst [vmem:[#allocation13_spill] sm:$0xff] %v2208_v20  ;;  %3518 = vst [vmem:[#allocation14_spill] sm:$0xff] %v2211_v21 }
  0xbd   :  { %v210_v22 = vpop.permute.xlu1 %209  ;;  %v205_v23 = vpop.permute.xlu0 %204 }
  0xbe   :  { %v2214_v24 = vmul.f32 %v2146_v42, %v210_v22  ;;  %v2217_v25 = vmul.f32 %v2146_v42, %v205_v23 }
  0xc0   :  { %3519 = vst [vmem:[#allocation15_spill] sm:$0xff] %v2214_v24  ;;  %3520 = vst [vmem:[#allocation16_spill] sm:$0xff] %v2217_v25 }
  0xc2   :  { %v254_v27 = vpop.permute.xlu1 %253  ;;  %v250_v28 = vpop.permute.xlu0 %249 }
  0xc3   :  { %v381_v31 = vmul.f32 %v2222_v26, %v254_v27  ;;  %v380_v32 = vmul.f32 %v2222_v26, %v250_v28  ;;  %v220_v28 = vmul.f32 %v2146_v42, %v2137_v39  ;;  %v2259_v39 = vmul.f32 %v2146_v42, %v2141_v41 }
  0xc5   :  { %v413_v43 = vadd.f32 %v381_v31, %v217_v30  ;;  %v412_v46 = vadd.f32 %v380_v32, %v216_v29 }
  0xc6   :  { %v258_v47 = vpop.permute.xlu1 %257  ;;  %v262_v50 = vpop.permute.xlu0 %261 }
  0xc7   :  { %v452_v51 = vadd.f32 %v2231_v33, %v413_v43  ;;  %v451_v54 = vadd.f32 %v2231_v33, %v412_v46  ;;  %v382_v35 = vmul.f32 %v2222_v26, %v258_v47  ;;  %v383_v37 = vmul.f32 %v2222_v26, %v262_v50 }
  0xc8   :  { %v221_v50 = vmul.f32 %v2146_v42, %v2135_v38 }
  0xc9   :  { %v1735_v59 = vround.rtne.f32 %v452_v51  ;;  %v1734_v62 = vround.rtne.f32 %v451_v54  ;;  %v414_v2 = vadd.f32 %v382_v35, %v218_v55  ;;  %v415_v3 = vadd.f32 %v383_v37, %v219_v58 }
  0xca   :  { %v266_v10 = vpop.permute.xlu1 %265  ;;  %v270_v27 = vpop.permute.xlu0 %269  ;;  %v2249_v37 = vcvt.f32.s32 %v452_v51  ;;  %v2255_v58 = vmul.f32 %v2146_v42, %v2139_v40 }
  0xcb   :  { %v516_v63 = vsub.f32 %v452_v51, %v1735_v59  ;;  %v515_v6 = vsub.f32 %v451_v54, %v1734_v62  ;;  %v453_v15 = vadd.f32 %v2231_v33, %v414_v2  ;;  %v454_v18 = vadd.f32 %v2231_v33, %v415_v3 }
  0xcc   :  { %v384_v34 = vmul.f32 %v2222_v26, %v266_v10  ;;  %v385_v47 = vmul.f32 %v2222_v26, %v270_v27  ;;  %v2267_v51 = vcvt.f32.s32 %v451_v54  ;;  %v1348_v54 = vadd.s32 1, %v2249_v37 }
  0xcd   :  { %v548_v7 = vmul.f32 1.5707964, %v516_v63  ;;  %v547_v11 = vmul.f32 1.5707964, %v515_v6  ;;  %v1736_v23 = vround.rtne.f32 %v453_v15  ;;  %v1737_v36 = vround.rtne.f32 %v454_v18 }
  0xce   :  { %v416_v46 = vadd.f32 %v384_v34, %v220_v28  ;;  %v2265_v63 = vmul.f32 %v2146_v42, %v2148_v44  ;;  %v417_v6 = vadd.f32 %v385_v47, %v221_v50  ;;  %v1284_v42 = vand.u32 2, %v2249_v37 }
  0xcf   :  { %v580_v14 = vmul.f32 %v548_v7, %v548_v7  ;;  %v579_v19 = vmul.f32 %v547_v11, %v547_v11  ;;  %v517_v31 = vsub.f32 %v453_v15, %v1736_v23  ;;  %v518_v43 = vsub.f32 %v454_v18, %v1737_v36 }
  0xd0   :  { %v2274_v41 = vadd.f32 %v2231_v33, %v416_v46  ;;  %v1155_v28 = vand.u32 1, %v2267_v51  ;;  %v2290_v50 = vcvt.f32.s32 %v454_v18 }
  0xd1   :  { %v612_v22 = vmul.f32 -0.0001984127, %v580_v14  ;;  %v611_v29 = vmul.f32 -0.0001984127, %v579_v19  ;;  %v2251_v55 = vmul.f32 1.5707964, %v517_v31 }
  0xd2   :  { %v2261_v62 = vmul.f32 1.5707964, %v518_v43  ;;  %v1738_v36 = vround.rtne.f32 %v2274_v41  ;;  %v2284_v43 = vadd.f32 %v2231_v33, %v417_v6  ;;  %vm2352_vm1 = vcmp.ne.s32.totalorder %v1155_v28, 0 }
  0xd3   :  { %v644_v30 = vadd.f32 0.008333333, %v612_v22  ;;  %v643_v32 = vadd.f32 0.008333333, %v611_v29  ;;  %v581_v2 = vmul.f32 %v2251_v55, %v2251_v55  ;;  %v1347_v29 = vadd.s32 1, %v2267_v51 }
  0xd4   :  { %v582_v40 = vmul.f32 %v2261_v62, %v2261_v62  ;;  %v2373_v20 = vcvt.f32.s32 %v2284_v43 }
  0xd5   :  { %v676_v35 = vmul.f32 %v644_v30, %v580_v14  ;;  %v675_v59 = vmul.f32 %v643_v32, %v579_v19  ;;  %v613_v44 = vmul.f32 -0.0001984127, %v581_v2  ;;  %v1379_v6 = vand.u32 2, %v1347_v29 }
  0xd6   :  { %v614_v23 = vmul.f32 -0.0001984127, %v582_v40 }
  0xd7   :  { %v708_v38 = vadd.f32 -0.16666667, %v676_v35  ;;  %v707_v3 = vadd.f32 -0.16666667, %v675_v59  ;;  %v645_v30 = vadd.f32 0.008333333, %v613_v44 }
  0xd8   :  { %v646_v32 = vadd.f32 0.008333333, %v614_v23  ;;  %v1283_v59 = vand.u32 2, %v2267_v51  ;;  %v1380_v44 = vand.u32 2, %v1348_v54 }
  0xd9   :  { %v740_v10 = vmul.f32 %v708_v38, %v580_v14  ;;  %v739_v22 = vmul.f32 %v707_v3, %v579_v19  ;;  %v519_v14 = vsub.f32 %v2274_v41, %v1738_v36  ;;  %v677_v47 = vmul.f32 %v645_v30, %v581_v2 }
  0xda   :  { %v2288_v19 = vcvt.f32.s32 %v453_v15  ;;  %v678_v38 = vmul.f32 %v646_v32, %v582_v40  ;;  %v2312_v32 = vshll.u32 %v1284_v42, 30 }
  0xdb   :  { %v772_v27 = vadd.f32 1.0, %v740_v10  ;;  %v771_v31 = vadd.f32 1.0, %v739_v22  ;;  %v2295_v3 = vmul.f32 1.5707964, %v519_v14  ;;  %v709_v22 = vadd.f32 -0.16666667, %v677_v47 }
  0xdc   :  { %v710_v15 = vadd.f32 -0.16666667, %v678_v38  ;;  %v1349_v36 = vadd.s32 1, %v2288_v19  ;;  %v2314_v14 = vshll.u32 %v1380_v44, 30  ;;  %v2316_v47 = vshll.u32 %v1283_v59, 30  ;;  %v274_v38 = vpop.permute.xlu1 %273 }
  0xdd   :  { %v2286_v46 = vmul.f32 %v772_v27, %v548_v7  ;;  %v2292_v35 = vmul.f32 %v771_v31, %v547_v11  ;;  %v583_v18 = vmul.f32 %v2295_v3, %v2295_v3  ;;  %v1739_v11 = vround.rtne.f32 %v2284_v43 }
  0xde   :  { %v741_v51 = vmul.f32 %v709_v22, %v581_v2  ;;  %v1350_v27 = vadd.s32 1, %v2290_v50  ;;  %v742_v54 = vmul.f32 %v710_v15, %v582_v40  ;;  %v2319_v2 = vshll.u32 %v1379_v6, 30 }
  0xdf   :  { %v836_v10 = vmul.f32 %v2286_v46, %v2286_v46  ;;  %v835_v7 = vmul.f32 %v2292_v35, %v2292_v35  ;;  %v615_v29 = vmul.f32 -0.0001984127, %v583_v18  ;;  %v520_v31 = vsub.f32 %v2284_v43, %v1739_v11 }
  0xe0   :  { %v1285_v40 = vand.u32 2, %v2288_v19  ;;  %v773_v22 = vadd.f32 1.0, %v741_v51  ;;  %v1381_v42 = vand.u32 2, %v1349_v36  ;;  %v1286_v44 = vand.u32 2, %v2290_v50 }
  0xe1   :  { %v2304_v23 = vsub.f32 1.0, %v836_v10  ;;  %v2308_v30 = vsub.f32 1.0, %v835_v7  ;;  %v774_v7 = vadd.f32 1.0, %v742_v54  ;;  %v647_v15 = vadd.f32 0.008333333, %v615_v29 }
  0xe2   :  { %v2323_v11 = vmul.f32 1.5707964, %v520_v31  ;;  %v1382_v34 = vand.u32 2, %v1350_v27  ;;  %v386_v59 = vmul.f32 %v2222_v26, %v274_v38  ;;  %v2328_v24 = vmul.f32 %v773_v22, %v2251_v55 }
  0xe3   :  { %1872 = vrsqrt.f32 %v2304_v23  ;;  %v2331_v6 = vmul.f32 %v774_v7, %v2261_v62  ;;  %v679_v10 = vmul.f32 %v647_v15, %v583_v18  ;;  %v2335_v54 = vshll.u32 %v1285_v40, 30 }
  0xe4   :  { %1874 = vrsqrt.f32 %v2308_v30  ;;  %v584_v51 = vmul.f32 %v2323_v11, %v2323_v11  ;;  %v1158_v29 = vand.u32 1, %v2290_v50  ;;  %v2339_v36 = vcvt.f32.s32 %v2274_v41  ;;  %v278_v50 = vpop.permute.xlu0 %277 }
  0xe5   :  { %v418_v27 = vadd.f32 %v386_v59, %v2259_v39  ;;  %v3521_v31 = vand.u32 1, %v2249_v37  ;;  %v837_v62 = vmul.f32 %v2328_v24, %v2328_v24  ;;  %v838_v38 = vmul.f32 %v2331_v6, %v2331_v6 }
  0xe6   :  { %v711_v40 = vadd.f32 -0.16666667, %v679_v10  ;;  %v616_v22 = vmul.f32 -0.0001984127, %v584_v51  ;;  %v2356_v39 = vshll.u32 %v1381_v42, 30  ;;  %v2358_v37 = vshll.u32 %v1286_v44, 30 }
  0xe7   :  { %vm2344_vm0 = vcmp.ne.s32.totalorder %v3521_v31, 0  ;;  %v2360_v7 = vshll.u32 %v1382_v34, 30  ;;  %v2363_v15 = vadd.f32 %v2231_v33, %v418_v27  ;;  %v2365_v59 = vsub.f32 1.0, %v837_v62 }
  0xe8   :  { %v2367_v31 = vsub.f32 1.0, %v838_v38  ;;  %v743_v10 = vmul.f32 %v711_v40, %v583_v18  ;;  %v648_v25 = vadd.f32 0.008333333, %v616_v22  ;;  %v2370_v28 = vadd.s32 1, %v2339_v36  ;;  %v282_v18 = vpop.permute.xlu1 %281 }
  0xe9   :  { %v1740_v42 = vround.rtne.f32 %v2363_v15  ;;  %v387_v34 = vmul.f32 %v2222_v26, %v278_v50  ;;  %vm908_vm2 = vcmp.eq.f32.partialorder %v2304_v23, inf  ;;  %vm910_vm3 = vcmp.eq.f32.partialorder %v2304_v23, 0.0 }
  0xea   :  { %v911_v27 = vand.u32 2147483648, %v2304_v23  ;;  %1876 = vrsqrt.f32 %v2365_v59  ;;  %vm901_vm4 = vcmp.eq.f32.partialorder %v2308_v30, inf  ;;  %vm903_vm5 = vcmp.eq.f32.partialorder %v2308_v30, 0.0 }
  0xeb   :  { %1878 = vrsqrt.f32 %v2367_v31  ;;  %v904_v40 = vand.u32 2147483648, %v2308_v30  ;;  %v775_v22 = vadd.f32 1.0, %v743_v10  ;;  %v680_v50 = vmul.f32 %v648_v25, %v584_v51 }
  0xec   :  { %v521_v16 = vsub.f32 %v2363_v15, %v1740_v42  ;;  %v419_v17 = vadd.f32 %v387_v34, %v2255_v58  ;;  %v3526_v55 = vand.u32 1, %v2288_v19  ;;  %vm2423_vm7 = vcmp.ne.s32.totalorder %v1158_v29, 0 }
  0xed   :  { %v1873_v44 = vpop.eup %1872  ;;  %v2395_v8 = vmul.f32 %v775_v22, %v2295_v3  ;;  %v1159_v19 = vand.u32 1, %v2339_v36  ;;  %vm915_vm8 = vcmp.eq.f32.partialorder %v2365_v59, inf  ;;  %vm917_vm9 = vcmp.eq.f32.partialorder %v2365_v59, 0.0 }
  0xee   :  { %v1875_v62 = vpop.eup %1874  ;;  %v907_v38 = vmul.f32 %v1873_v44, %v2304_v23  ;;  %v388_v44 = vmul.f32 %v2222_v26, %v282_v18  ;;  %v2405_v42 = vmul.f32 1.5707964, %v521_v16  ;;  %vm2417_vm6 = vcmp.ne.s32.totalorder %v3526_v55, 0 }
  0xef   :  { %v900_v43 = vmul.f32 %v1875_v62, %v2308_v30  ;;  %v712_v62 = vadd.f32 -0.16666667, %v680_v50  ;;  %v2437_v41 = vadd.f32 %v2231_v33, %v419_v17  ;;  %vm922_vm10 = vcmp.eq.f32.partialorder %v2367_v31, inf }
  0xf0   :  { %v909_v21 = vsel %vm908_vm2, %v2304_v23, %v907_v38  ;;  %vm924_vm11 = vcmp.eq.f32.partialorder %v2367_v31, 0.0  ;;  %v925_v50 = vand.u32 2147483648, %v2367_v31  ;;  %vm2486_vm12 = vcmp.ne.s32.totalorder %v1159_v19, 0 }
  0xf1   :  { %v912_v12 = vsel %vm910_vm3, %v911_v27, %v909_v21  ;;  %v902_v13 = vsel %vm901_vm4, %v2308_v30, %v900_v43  ;;  %v839_v30 = vmul.f32 %v2395_v8, %v2395_v8  ;;  %v918_v43 = vand.u32 2147483648, %v2365_v59 }
  0xf2   :  { %v1220_v25 = vsel %vm2344_vm0, %v912_v12, %v2286_v46  ;;  %v1252_v10 = vsel %vm2344_vm0, %v2286_v46, %v912_v12  ;;  %v905_v58 = vsel %vm903_vm5, %v904_v40, %v902_v13  ;;  %v1288_v19 = vand.u32 2, %v2373_v20 }
  0xf3   :  { %v1476_v21 = vxor.u32 %v2312_v32, %v1220_v25  ;;  %v1572_v23 = vxor.u32 %v2314_v14, %v1252_v10  ;;  %v1219_v3 = vsel %vm2352_vm1, %v905_v58, %v2292_v35  ;;  %v1251_v34 = vsel %vm2352_vm1, %v2292_v35, %v905_v58 }
  0xf4   :  { %v1475_v13 = vxor.u32 %v2316_v47, %v1219_v3  ;;  %v1571_v16 = vxor.u32 %v2319_v2, %v1251_v34  ;;  %v744_v32 = vmul.f32 %v712_v62, %v584_v51  ;;  %v1287_v35 = vand.u32 2, %v2339_v36  ;;  %v1877_v27 = vpop.eup %1876 }
  0xf5   :  { %1636 = vst [vmem:[#allocation2 + $0x8] sm:$0xff] %v1476_v21  ;;  %1668 = vst [vmem:[#allocation4 + $0x8] sm:$0xff] %v1572_v23  ;;  %v1383_v14 = vand.u32 2, %v2370_v28  ;;  %v585_v47 = vmul.f32 %v2405_v42, %v2405_v42  ;;  %v2434_v2 = vsub.f32 1.0, %v839_v30  ;;  %v420_v51 = vadd.f32 %v388_v44, %v2265_v63  ;;  %v1879_v18 = vpop.eup %1878 }
  0xf6   :  { %1635 = vst [vmem:[#allocation2] sm:$0xff] %v1475_v13  ;;  %1667 = vst [vmem:[#allocation4] sm:$0xff] %v1571_v16  ;;  %v776_v29 = vadd.f32 1.0, %v744_v32  ;;  %v2443_v36 = vadd.s32 1, %v2373_v20  ;;  %v914_v38 = vmul.f32 %v1877_v27, %v2365_v59  ;;  %v921_v17 = vmul.f32 %v1879_v18, %v2367_v31  ;;  %v286_v16 = vpop.permute.xlu0 %285 }
  0xf7   :  { %v617_v28 = vmul.f32 -0.0001984127, %v585_v47  ;;  %1880 = vrsqrt.f32 %v2434_v2  ;;  %v1741_v44 = vround.rtne.f32 %v2437_v41  ;;  %v2458_v62 = vadd.f32 %v2231_v33, %v420_v51 }
  0xf8   :  { %v2452_v63 = vmul.f32 %v776_v29, %v2323_v11  ;;  %v916_v22 = vsel %vm915_vm8, %v2365_v59, %v914_v38  ;;  %v923_v10 = vsel %vm922_vm10, %v2367_v31, %v921_v17  ;;  %v290_v29 = vpop.permute.xlu1 %289  ;;  %v1160_v18 = vand.u32 1, %v2373_v20 }
  0xf9   :  { %v649_v40 = vadd.f32 0.008333333, %v617_v28  ;;  %v919_v25 = vsel %vm917_vm9, %v918_v43, %v916_v22  ;;  %v926_v3 = vsel %vm924_vm11, %v925_v50, %v923_v10  ;;  %v522_v34 = vsub.f32 %v2437_v41, %v1741_v44 }
  0xfa   :  { %v840_v58 = vmul.f32 %v2452_v63, %v2452_v63  ;;  %v1221_v21 = vsel %vm2417_vm6, %v919_v25, %v2328_v24  ;;  %v1253_v23 = vsel %vm2417_vm6, %v2328_v24, %v919_v25  ;;  %v1222_v31 = vsel %vm2423_vm7, %v926_v3, %v2331_v6 }
  0xfb   :  { %v681_v11 = vmul.f32 %v649_v40, %v585_v47  ;;  %v1477_v59 = vxor.u32 %v2335_v54, %v1221_v21  ;;  %v1573_v55 = vxor.u32 %v2356_v39, %v1253_v23  ;;  %v1254_v13 = vsel %vm2423_vm7, %v2331_v6, %v926_v3 }
  0xfc   :  { %v1478_v30 = vxor.u32 %v2358_v37, %v1222_v31  ;;  %v1574_v24 = vxor.u32 %v2360_v7, %v1254_v13  ;;  %v2482_v12 = vsub.f32 1.0, %v840_v58  ;;  %v2484_v54 = vmul.f32 1.5707964, %v522_v34 }
  0xfd   :  { %v713_v32 = vadd.f32 -0.16666667, %v681_v11  ;;  %1637 = vst [vmem:[#allocation2 + $0x10] sm:$0xff] %v1477_v59  ;;  %1669 = vst [vmem:[#allocation4 + $0x10] sm:$0xff] %v1573_v55  ;;  %v1319_v6 = vshll.u32 %v1287_v35, 30  ;;  %v389_v37 = vmul.f32 %v2222_v26, %v286_v16  ;;  %v1415_v7 = vshll.u32 %v1383_v14, 30 }
  0xfe   :  { %1638 = vst [vmem:[#allocation2 + $0x18] sm:$0xff] %v1478_v30  ;;  %1670 = vst [vmem:[#allocation4 + $0x18] sm:$0xff] %v1574_v24  ;;  %1882 = vrsqrt.f32 %v2482_v12  ;;  %v586_v51 = vmul.f32 %v2484_v54, %v2484_v54  ;;  %v390_v27 = vmul.f32 %v2222_v26, %v290_v29  ;;  %v1384_v38 = vand.u32 2, %v2443_v36 }
  0xff   :  { %v745_v46 = vmul.f32 %v713_v32, %v585_v47  ;;  %v1742_v35 = vround.rtne.f32 %v2458_v62  ;;  %vm929_vm13 = vcmp.eq.f32.partialorder %v2434_v2, inf  ;;  %vm931_vm14 = vcmp.eq.f32.partialorder %v2434_v2, 0.0 }
 0x100   :  { %v618_v47 = vmul.f32 -0.0001984127, %v586_v51  ;;  %v932_v17 = vand.u32 2147483648, %v2434_v2  ;;  %v421_v22 = vadd.f32 %v389_v37, %v2151_v45  ;;  %v422_v44 = vadd.f32 %v390_v27, %v2157_v49 }
 0x101   :  { %v1881_v28 = vpop.eup %1880  ;;  %v777_v14 = vadd.f32 1.0, %v745_v46  ;;  %v523_v40 = vsub.f32 %v2458_v62, %v1742_v35  ;;  %vm2510_vm15 = vcmp.ne.s32.totalorder %v1160_v18, 0  ;;  %v1320_v58 = vshll.u32 %v1288_v19, 30 }
 0x102   :  { %v928_v43 = vmul.f32 %v1881_v28, %v2434_v2  ;;  %v650_v50 = vadd.f32 0.008333333, %v618_v47  ;;  %v1786_v11 = vcvt.f32.s32 %v2363_v15  ;;  %v1416_v34 = vshll.u32 %v1384_v38, 30 }
 0x103   :  { %v2507_v36 = vmul.f32 %v777_v14, %v2405_v42  ;;  %v2515_v21 = vmul.f32 1.5707964, %v523_v40  ;;  %v2530_v31 = vadd.f32 %v2231_v33, %v421_v22  ;;  %v2533_v13 = vadd.f32 %v2231_v33, %v422_v44  ;;  %v294_v40 = vpop.permute.xlu0 %293 }
 0x104   :  { %v930_v20 = vsel %vm929_vm13, %v2434_v2, %v928_v43  ;;  %v682_v2 = vmul.f32 %v650_v50, %v586_v51  ;;  %v1161_v16 = vand.u32 1, %v1786_v11  ;;  %v1289_v30 = vand.u32 2, %v1786_v11 }
 0x105   :  { %v933_v25 = vsel %vm931_vm14, %v932_v17, %v930_v20  ;;  %v841_v49 = vmul.f32 %v2507_v36, %v2507_v36  ;;  %v587_v15 = vmul.f32 %v2515_v21, %v2515_v21  ;;  %v1353_v24 = vadd.s32 1, %v1786_v11 }
 0x106   :  { %v1223_v45 = vsel %vm2486_vm12, %v933_v25, %v2395_v8  ;;  %v1255_v42 = vsel %vm2486_vm12, %v2395_v8, %v933_v25  ;;  %v714_v55 = vadd.f32 -0.16666667, %v682_v2  ;;  %vm936_vm0 = vcmp.eq.f32.partialorder %v2482_v12, inf  ;;  %v298_v25 = vpop.permute.xlu1 %297 }
 0x107   :  { %v1479_v23 = vxor.u32 %v1319_v6, %v1223_v45  ;;  %v1575_v3 = vxor.u32 %v1415_v7, %v1255_v42  ;;  %v2527_v59 = vsub.f32 1.0, %v841_v49  ;;  %v619_v32 = vmul.f32 -0.0001984127, %v587_v15 }
 0x108   :  { %v1883_v8 = vpop.eup %1882  ;;  %v2539_v39 = vcvt.f32.s32 %v2437_v41  ;;  %v939_v6 = vand.u32 2147483648, %v2482_v12  ;;  %v746_v37 = vmul.f32 %v714_v55, %v586_v51  ;;  %v1743_v46 = vround.rtne.f32 %v2530_v31 }
 0x109   :  { %1639 = vst [vmem:[#allocation2 + $0x20] sm:$0xff] %v1479_v23  ;;  %1671 = vst [vmem:[#allocation4 + $0x20] sm:$0xff] %v1575_v3  ;;  %v935_v29 = vmul.f32 %v1883_v8, %v2482_v12  ;;  %1884 = vrsqrt.f32 %v2527_v59  ;;  %v651_v7 = vadd.f32 0.008333333, %v619_v32  ;;  %vm938_vm1 = vcmp.eq.f32.partialorder %v2482_v12, 0.0 }
 0x10a   :  { %v2546_v28 = vcvt.f32.s32 %v2458_v62  ;;  %v1744_v18 = vround.rtne.f32 %v2533_v13  ;;  %v778_v38 = vadd.f32 1.0, %v746_v37  ;;  %v524_v41 = vsub.f32 %v2530_v31, %v1743_v46 }
 0x10b   :  { %v937_v27 = vsel %vm936_vm0, %v2482_v12, %v935_v29  ;;  %v683_v35 = vmul.f32 %v651_v7, %v587_v15  ;;  %v1385_v14 = vand.u32 2, %v1353_v24  ;;  %vm2559_vm2 = vcmp.ne.s32.totalorder %v1161_v16, 0 }
 0x10c   :  { %v940_v19 = vsel %vm938_vm1, %v939_v6, %v937_v27  ;;  %v2557_v62 = vmul.f32 %v778_v38, %v2484_v54  ;;  %v1321_v20 = vshll.u32 %v1289_v30, 30  ;;  %v1354_v50 = vadd.s32 1, %v2539_v39 }
 0x10d   :  { %v1224_v51 = vsel %vm2510_vm15, %v940_v19, %v2452_v63  ;;  %v1256_v43 = vsel %vm2510_vm15, %v2452_v63, %v940_v19  ;;  %v715_v17 = vadd.f32 -0.16666667, %v683_v35  ;;  %v2564_v44 = vmul.f32 1.5707964, %v524_v41 }
 0x10e   :  { %v1480_v12 = vxor.u32 %v1320_v58, %v1224_v51  ;;  %v1576_v47 = vxor.u32 %v1416_v34, %v1256_v43  ;;  %v842_v63 = vmul.f32 %v2557_v62, %v2557_v62  ;;  %v1355_v54 = vadd.s32 1, %v2546_v28 }
 0x10f   :  { %v747_v10 = vmul.f32 %v715_v17, %v587_v15  ;;  %v525_v58 = vsub.f32 %v2533_v13, %v1744_v18  ;;  %v1417_v11 = vshll.u32 %v1385_v14, 30  ;;  %v1162_v45 = vand.u32 1, %v2539_v39 }
 0x110   :  { %1640 = vst [vmem:[#allocation2 + $0x28] sm:$0xff] %v1480_v12  ;;  %1672 = vst [vmem:[#allocation4 + $0x28] sm:$0xff] %v1576_v47  ;;  %v588_v42 = vmul.f32 %v2564_v44, %v2564_v44  ;;  %v391_v49 = vmul.f32 %v2222_v26, %v294_v40  ;;  %v2574_v2 = vsub.f32 1.0, %v842_v63  ;;  %v392_v34 = vmul.f32 %v2222_v26, %v298_v25 }
 0x111   :  { %v779_v23 = vadd.f32 1.0, %v747_v10  ;;  %v2576_v3 = vmul.f32 1.5707964, %v525_v58  ;;  %v1290_v55 = vand.u32 2, %v2539_v39  ;;  %v1386_v8 = vand.u32 2, %v1354_v50 }
 0x112   :  { %v1291_v16 = vand.u32 2, %v2546_v28  ;;  %v620_v30 = vmul.f32 -0.0001984127, %v588_v42  ;;  %vm943_vm3 = vcmp.eq.f32.partialorder %v2527_v59, inf  ;;  %1886 = vrsqrt.f32 %v2574_v2 }
 0x113   :  { %v1885_v15 = vpop.eup %1884  ;;  %v1387_v32 = vand.u32 2, %v1355_v54  ;;  %v946_v29 = vand.u32 2147483648, %v2527_v59  ;;  %v2586_v6 = vmul.f32 %v779_v23, %v2515_v21  ;;  %v589_v39 = vmul.f32 %v2576_v3, %v2576_v3 }
 0x114   :  { %v942_v24 = vmul.f32 %v1885_v15, %v2527_v59  ;;  %v652_v37 = vadd.f32 0.008333333, %v620_v30  ;;  %vm945_vm4 = vcmp.eq.f32.partialorder %v2527_v59, 0.0  ;;  %v423_v46 = vadd.f32 %v391_v49, %v2154_v48 }
 0x115   :  { %v424_v27 = vadd.f32 %v392_v34, %v2163_v53  ;;  %v843_v19 = vmul.f32 %v2586_v6, %v2586_v6  ;;  %v621_v35 = vmul.f32 -0.0001984127, %v589_v39  ;;  %v2611_v12 = vcvt.f32.s32 %v2530_v31 }
 0x116   :  { %v944_v7 = vsel %vm943_vm3, %v2527_v59, %v942_v24  ;;  %v684_v38 = vmul.f32 %v652_v37, %v588_v42  ;;  %v2603_v59 = vadd.f32 %v2231_v33, %v423_v46  ;;  %vm2615_vm5 = vcmp.ne.s32.totalorder %v1162_v45, 0 }
 0x117   :  { %v947_v18 = vsel %vm945_vm4, %v946_v29, %v944_v7  ;;  %v2606_v48 = vadd.f32 %v2231_v33, %v424_v27  ;;  %v2608_v43 = vsub.f32 1.0, %v843_v19  ;;  %v653_v47 = vadd.f32 0.008333333, %v621_v35 }
 0x118   :  { %v1225_v21 = vsel %vm2559_vm2, %v947_v18, %v2507_v36  ;;  %v1257_v41 = vsel %vm2559_vm2, %v2507_v36, %v947_v18  ;;  %v716_v14 = vadd.f32 -0.16666667, %v684_v38  ;;  %v1745_v17 = vround.rtne.f32 %v2603_v59 }
 0x119   :  { %v1481_v53 = vxor.u32 %v1321_v20, %v1225_v21  ;;  %v1577_v51 = vxor.u32 %v1417_v11, %v1257_v41  ;;  %v1746_v40 = vround.rtne.f32 %v2606_v48  ;;  %v1322_v22 = vshll.u32 %v1290_v55, 30 }
 0x11a   :  { %v1418_v20 = vshll.u32 %v1386_v8, 30  ;;  %1888 = vrsqrt.f32 %v2608_v43  ;;  %v1163_v50 = vand.u32 1, %v2546_v28  ;;  %v748_v25 = vmul.f32 %v716_v14, %v588_v42 }
 0x11b   :  { %1641 = vst [vmem:[#allocation2 + $0x30] sm:$0xff] %v1481_v53  ;;  %1673 = vst [vmem:[#allocation4 + $0x30] sm:$0xff] %v1577_v51  ;;  %v685_v31 = vmul.f32 %v653_v47, %v589_v39  ;;  %v526_v63 = vsub.f32 %v2603_v59, %v1745_v17  ;;  %v2622_v10 = vshll.u32 %v1291_v16, 30  ;;  %v2624_v54 = vshll.u32 %v1387_v32, 30  ;;  %v302_v17 = vpop.permute.xlu0 %301 }
 0x11c   :  { %v2627_v58 = vcvt.f32.s32 %v2533_v13  ;;  %v527_v11 = vsub.f32 %v2606_v48, %v1746_v40  ;;  %v1887_v45 = vpop.eup %1886  ;;  %v780_v49 = vadd.f32 1.0, %v748_v25  ;;  %v1164_v23 = vand.u32 1, %v2611_v12  ;;  %v306_v40 = vpop.permute.xlu1 %305 }
 0x11d   :  { %v717_v34 = vadd.f32 -0.16666667, %v685_v31  ;;  %v2631_v15 = vmul.f32 1.5707964, %v526_v63  ;;  %v949_v28 = vmul.f32 %v1887_v45, %v2574_v2  ;;  %vm950_vm6 = vcmp.eq.f32.partialorder %v2574_v2, inf }
 0x11e   :  { %v2636_v42 = vadd.s32 1, %v2611_v12  ;;  %v2638_v55 = vmul.f32 1.5707964, %v527_v11  ;;  %v953_v13 = vand.u32 2147483648, %v2574_v2  ;;  %v2642_v8 = vmul.f32 %v780_v49, %v2564_v44 }
 0x11f   :  { %v749_v16 = vmul.f32 %v717_v34, %v589_v39  ;;  %v590_v30 = vmul.f32 %v2631_v15, %v2631_v15  ;;  %v951_v24 = vsel %vm950_vm6, %v2574_v2, %v949_v28  ;;  %vm952_vm7 = vcmp.eq.f32.partialorder %v2574_v2, 0.0 }
 0x120   :  { %vm2648_vm8 = vcmp.ne.s32.totalorder %v1163_v50, 0  ;;  %v1292_v29 = vand.u32 2, %v2611_v12  ;;  %v591_v37 = vmul.f32 %v2638_v55, %v2638_v55  ;;  %v954_v7 = vsel %vm952_vm7, %v953_v13, %v951_v24 }
 0x121   :  { %v844_v44 = vmul.f32 %v2642_v8, %v2642_v8  ;;  %v781_v39 = vadd.f32 1.0, %v749_v16  ;;  %v622_v46 = vmul.f32 -0.0001984127, %v590_v30  ;;  %v1226_v27 = vsel %vm2615_vm5, %v954_v7, %v2557_v62 }
 0x122   :  { %v1258_v2 = vsel %vm2615_vm5, %v2557_v62, %v954_v7  ;;  %v1388_v18 = vand.u32 2, %v2636_v42  ;;  %v623_v19 = vmul.f32 -0.0001984127, %v591_v37  ;;  %v1482_v38 = vxor.u32 %v1322_v22, %v1226_v27 }
 0x123   :  { %v1578_v35 = vxor.u32 %v1418_v20, %v1258_v2  ;;  %v2664_v21 = vsub.f32 1.0, %v844_v44  ;;  %v2667_v41 = vmul.f32 %v781_v39, %v2576_v3  ;;  %v1293_v51 = vand.u32 2, %v2627_v58 }
 0x124   :  { %v1889_v53 = vpop.eup %1888  ;;  %v1357_v14 = vadd.s32 1, %v2627_v58  ;;  %v654_v12 = vadd.f32 0.008333333, %v622_v46  ;;  %v655_v47 = vadd.f32 0.008333333, %v623_v19  ;;  %1642 = vst [vmem:[#allocation2 + $0x38] sm:$0xff] %v1482_v38  ;;  %v2675_v3 = vcvt.f32.s32 %v2603_v59 }
 0x125   :  { %1674 = vst [vmem:[#allocation4 + $0x38] sm:$0xff] %v1578_v35  ;;  %v956_v62 = vmul.f32 %v1889_v53, %v2608_v43  ;;  %vm957_vm9 = vcmp.eq.f32.partialorder %v2608_v43, inf  ;;  %1890 = vrsqrt.f32 %v2664_v21  ;;  %v960_v36 = vand.u32 2147483648, %v2608_v43 }
 0x126   :  { %v845_v22 = vmul.f32 %v2667_v41, %v2667_v41  ;;  %v686_v20 = vmul.f32 %v654_v12, %v590_v30  ;;  %v687_v50 = vmul.f32 %v655_v47, %v591_v37  ;;  %vm959_vm10 = vcmp.eq.f32.partialorder %v2608_v43, 0.0 }
 0x127   :  { %v958_v25 = vsel %vm957_vm9, %v2608_v43, %v956_v62  ;;  %v393_v31 = vmul.f32 %v2222_v26, %v302_v17  ;;  %v394_v63 = vmul.f32 %v2222_v26, %v306_v40  ;;  %v1389_v42 = vand.u32 2, %v1357_v14 }
 0x128   :  { %v961_v11 = vsel %vm959_vm10, %v960_v36, %v958_v25  ;;  %v2684_v45 = vsub.f32 1.0, %v845_v22  ;;  %v718_v59 = vadd.f32 -0.16666667, %v686_v20  ;;  %v719_v49 = vadd.f32 -0.16666667, %v687_v50 }
 0x129   :  { %v1227_v34 = vsel %vm2648_vm8, %v961_v11, %v2586_v6  ;;  %v1259_v28 = vsel %vm2648_vm8, %v2586_v6, %v961_v11  ;;  %v425_v43 = vadd.f32 %v393_v31, %v2160_v52  ;;  %v1324_v24 = vshll.u32 %v1292_v29, 30  ;;  %v310_v29 = vpop.permute.xlu0 %309 }
 0x12a   :  { %v1483_v13 = vxor.u32 %v2622_v10, %v1227_v34  ;;  %v1579_v16 = vxor.u32 %v2624_v54, %v1259_v28  ;;  %1892 = vrsqrt.f32 %v2684_v45  ;;  %vm2696_vm11 = vcmp.ne.s32.totalorder %v1164_v23, 0 }
 0x12b   :  { %v1165_v44 = vand.u32 1, %v2627_v58  ;;  %v750_v39 = vmul.f32 %v718_v59, %v590_v30  ;;  %v2702_v32 = vadd.s32 1, %v2675_v3  ;;  %v751_v6 = vmul.f32 %v719_v49, %v591_v37 }
 0x12c   :  { %1643 = vst [vmem:[#allocation2 + $0x40] sm:$0xff] %v1483_v13  ;;  %1675 = vst [vmem:[#allocation4 + $0x40] sm:$0xff] %v1579_v16  ;;  %v1420_v52 = vshll.u32 %v1388_v18, 30  ;;  %v2705_v10 = vcvt.f32.s32 %v2606_v48  ;;  %v2708_v54 = vadd.f32 %v2231_v33, %v425_v43  ;;  %v426_v23 = vadd.f32 %v394_v63, %v2169_v57 }
 0x12d   :  { %v1325_v46 = vshll.u32 %v1293_v51, 30  ;;  %v1421_v27 = vshll.u32 %v1389_v42, 30  ;;  %v782_v58 = vadd.f32 1.0, %v750_v39  ;;  %v783_v30 = vadd.f32 1.0, %v751_v6  ;;  %v314_v51 = vpop.permute.xlu1 %313 }
 0x12e   :  { %v1166_v2 = vand.u32 1, %v2675_v3  ;;  %v1294_v37 = vand.u32 2, %v2675_v3  ;;  %v1747_v19 = vround.rtne.f32 %v2708_v54  ;;  %v2715_v18 = vadd.f32 %v2231_v33, %v426_v23 }
 0x12f   :  { %v1891_v48 = vpop.eup %1890  ;;  %v2718_v38 = vmul.f32 %v782_v58, %v2631_v15  ;;  %v1390_v57 = vand.u32 2, %v2702_v32  ;;  %v2722_v35 = vmul.f32 %v783_v30, %v2638_v55  ;;  %v395_v53 = vmul.f32 %v2222_v26, %v310_v29 }
 0x130   :  { %v963_v14 = vmul.f32 %v1891_v48, %v2664_v21  ;;  %vm964_vm12 = vcmp.eq.f32.partialorder %v2664_v21, inf  ;;  %vm2727_vm13 = vcmp.ne.s32.totalorder %v1165_v44, 0  ;;  %v1359_v47 = vadd.s32 1, %v2705_v10 }
 0x131   :  { %v528_v15 = vsub.f32 %v2708_v54, %v1747_v19  ;;  %v967_v17 = vand.u32 2147483648, %v2664_v21  ;;  %v846_v55 = vmul.f32 %v2718_v38, %v2718_v38  ;;  %v847_v40 = vmul.f32 %v2722_v35, %v2722_v35 }
 0x132   :  { %v1748_v62 = vround.rtne.f32 %v2715_v18  ;;  %v965_v3 = vsel %vm964_vm12, %v2664_v21, %v963_v14  ;;  %vm966_vm14 = vcmp.eq.f32.partialorder %v2664_v21, 0.0  ;;  %v396_v22 = vmul.f32 %v2222_v26, %v314_v51 }
 0x133   :  { %v2741_v36 = vmul.f32 1.5707964, %v528_v15  ;;  %v968_v20 = vsel %vm966_vm14, %v967_v17, %v965_v3  ;;  %v2744_v50 = vsub.f32 1.0, %v846_v55  ;;  %v2746_v25 = vsub.f32 1.0, %v847_v40 }
 0x134   :  { %v427_v31 = vadd.f32 %v395_v53, %v2166_v56  ;;  %v1893_v63 = vpop.eup %1892  ;;  %v1228_v11 = vsel %vm2696_vm11, %v968_v20, %v2642_v8  ;;  %v1260_v21 = vsel %vm2696_vm11, %v2642_v8, %v968_v20  ;;  %v529_v49 = vsub.f32 %v2715_v18, %v1748_v62  ;;  %v318_v8 = vpop.permute.xlu0 %317 }
 0x135   :  { %v592_v59 = vmul.f32 %v2741_v36, %v2741_v36  ;;  %v1484_v34 = vxor.u32 %v1324_v24, %v1228_v11  ;;  %v1580_v28 = vxor.u32 %v1420_v52, %v1260_v21  ;;  %v970_v42 = vmul.f32 %v1893_v63, %v2684_v45 }
 0x136   :  { %1894 = vrsqrt.f32 %v2744_v50  ;;  %vm971_vm15 = vcmp.eq.f32.partialorder %v2684_v45, inf  ;;  %v974_v56 = vand.u32 2147483648, %v2684_v45  ;;  %v1167_v43 = vand.u32 1, %v2705_v10 }
 0x137   :  { %1896 = vrsqrt.f32 %v2746_v25  ;;  %1644 = vst [vmem:[#allocation2 + $0x48] sm:$0xff] %v1484_v34  ;;  %1676 = vst [vmem:[#allocation4 + $0x48] sm:$0xff] %v1580_v28  ;;  %v972_v13 = vsel %vm971_vm15, %v2684_v45, %v970_v42  ;;  %vm973_vm0 = vcmp.eq.f32.partialorder %v2684_v45, 0.0  ;;  %v1295_v16 = vand.u32 2, %v2705_v10 }
 0x138   :  { %v1391_v24 = vand.u32 2, %v1359_v47  ;;  %v975_v7 = vsel %vm973_vm0, %v974_v56, %v972_v13  ;;  %v624_v44 = vmul.f32 -0.0001984127, %v592_v59  ;;  %v2767_v39 = vmul.f32 1.5707964, %v529_v49  ;;  %v322_v13 = vpop.permute.xlu1 %321 }
 0x139   :  { %v428_v32 = vadd.f32 %v396_v22, %v2175_v61  ;;  %v1229_v6 = vsel %vm2727_vm13, %v975_v7, %v2667_v41  ;;  %v1261_v52 = vsel %vm2727_vm13, %v2667_v41, %v975_v7  ;;  %v2777_v23 = vadd.f32 %v2231_v33, %v427_v31 }
 0x13a   :  { %v397_v45 = vmul.f32 %v2222_v26, %v318_v8  ;;  %v1485_v10 = vxor.u32 %v1325_v46, %v1229_v6  ;;  %v1581_v29 = vxor.u32 %v1421_v27, %v1261_v52  ;;  %v656_v58 = vadd.f32 0.008333333, %v624_v44  ;;  %v2790_v26 = vld [vmem:[%s3509_s2] ss:$0 sm:$0xff] }
 0x13b   :  { %v593_v30 = vmul.f32 %v2767_v39, %v2767_v39  ;;  %vm2782_vm1 = vcmp.ne.s32.totalorder %v1166_v2, 0  ;;  %v1326_v19 = vshll.u32 %v1294_v37, 30  ;;  %v1749_v48 = vround.rtne.f32 %v2777_v23 }
 0x13c   :  { %1645 = vst [vmem:[#allocation2 + $0x50] sm:$0xff] %v1485_v10  ;;  %1677 = vst [vmem:[#allocation4 + $0x50] sm:$0xff] %v1581_v29  ;;  %v1422_v41 = vshll.u32 %v1390_v57, 30  ;;  %v688_v33 = vmul.f32 %v656_v58, %v592_v59  ;;  %v2793_v46 = vadd.f32 %v2790_v26, %v428_v32  ;;  %vm2795_vm2 = vcmp.ne.s32.totalorder %v1167_v43, 0 }
 0x13d   :  { %v625_v53 = vmul.f32 -0.0001984127, %v593_v30  ;;  %v1327_v2 = vshll.u32 %v1295_v16, 30  ;;  %v1423_v37 = vshll.u32 %v1391_v24, 30  ;;  %v530_v51 = vsub.f32 %v2777_v23, %v1749_v48 }
 0x13e   :  { %v720_v14 = vadd.f32 -0.16666667, %v688_v33  ;;  %v2801_v57 = vcvt.f32.s32 %v2708_v54  ;;  %v429_v47 = vadd.f32 %v397_v45, %v2172_v60  ;;  %vm978_vm3 = vcmp.eq.f32.partialorder %v2744_v50, inf  ;;  %v2845_v45 = vld [vmem:[%s3508_s1 + $0x1] ss:$0 sm:$0xff] }
 0x13f   :  { %v657_v12 = vadd.f32 0.008333333, %v625_v53  ;;  %vm980_vm4 = vcmp.eq.f32.partialorder %v2744_v50, 0.0  ;;  %v2806_v17 = vmul.f32 1.5707964, %v530_v51  ;;  %v1750_v55 = vround.rtne.f32 %v2793_v46 }
 0x140   :  { %v1895_v15 = vpop.eup %1894  ;;  %v981_v3 = vand.u32 2147483648, %v2744_v50  ;;  %v752_v22 = vmul.f32 %v720_v14, %v592_v59  ;;  %vm985_vm5 = vcmp.eq.f32.partialorder %v2746_v25, inf  ;;  %vm987_vm6 = vcmp.eq.f32.partialorder %v2746_v25, 0.0 }
 0x141   :  { %v1897_v40 = vpop.eup %1896  ;;  %v977_v62 = vmul.f32 %v1895_v15, %v2744_v50  ;;  %v689_v54 = vmul.f32 %v657_v12, %v593_v30  ;;  %v594_v60 = vmul.f32 %v2806_v17, %v2806_v17  ;;  %v988_v63 = vand.u32 2147483648, %v2746_v25 }
 0x142   :  { %v984_v20 = vmul.f32 %v1897_v40, %v2746_v25  ;;  %v784_v11 = vadd.f32 1.0, %v752_v22  ;;  %v531_v28 = vsub.f32 %v2793_v46, %v1750_v55  ;;  %v1810_v58 = vcvt.f32.s32 %v2715_v18 }
 0x143   :  { %v979_v31 = vsel %vm978_vm3, %v2744_v50, %v977_v62  ;;  %v721_v21 = vadd.f32 -0.16666667, %v689_v54  ;;  %v626_v34 = vmul.f32 -0.0001984127, %v594_v60  ;;  %v1168_v48 = vand.u32 1, %v2801_v57 }
 0x144   :  { %v982_v49 = vsel %vm980_vm4, %v981_v3, %v979_v31  ;;  %v986_v59 = vsel %vm985_vm5, %v2746_v25, %v984_v20  ;;  %v2829_v8 = vmul.f32 %v784_v11, %v2741_v36  ;;  %v1360_v36 = vadd.s32 1, %v2801_v57 }
 0x145   :  { %v1230_v42 = vsel %vm2782_vm1, %v982_v49, %v2718_v38  ;;  %v1262_v56 = vsel %vm2782_vm1, %v2718_v38, %v982_v49  ;;  %v989_v43 = vsel %vm987_vm6, %v988_v63, %v986_v59  ;;  %v753_v32 = vmul.f32 %v721_v21, %v593_v30 }
 0x146   :  { %v1486_v50 = vxor.u32 %v1326_v19, %v1230_v42  ;;  %v1582_v16 = vxor.u32 %v1422_v41, %v1262_v56  ;;  %v1231_v25 = vsel %vm2795_vm2, %v989_v43, %v2722_v35  ;;  %v1263_v24 = vsel %vm2795_vm2, %v2722_v35, %v989_v43 }
 0x147   :  { %v1487_v7 = vxor.u32 %v1327_v2, %v1231_v25  ;;  %v1583_v44 = vxor.u32 %v1423_v37, %v1263_v24  ;;  %v848_v38 = vmul.f32 %v2829_v8, %v2829_v8  ;;  %v658_v6 = vadd.f32 0.008333333, %v626_v34  ;;  %v330_v25 = vpop.permute.xlu1 %329 }
 0x148   :  { %1646 = vst [vmem:[#allocation2 + $0x58] sm:$0xff] %v1486_v50  ;;  %1678 = vst [vmem:[#allocation4 + $0x58] sm:$0xff] %v1582_v16  ;;  %v2840_v52 = vmul.f32 1.5707964, %v531_v28  ;;  %v398_v35 = vmul.f32 %v2845_v45, %v322_v13  ;;  %v785_v29 = vadd.f32 1.0, %v753_v32  ;;  %v2852_v30 = vadd.f32 %v2790_v26, %v429_v47 }
 0x149   :  { %1647 = vst [vmem:[#allocation2 + $0x60] sm:$0xff] %v1487_v7  ;;  %1679 = vst [vmem:[#allocation4 + $0x60] sm:$0xff] %v1583_v44  ;;  %v2848_v10 = vsub.f32 1.0, %v848_v38  ;;  %v690_v61 = vmul.f32 %v658_v6, %v594_v60  ;;  %v1296_v18 = vand.u32 2, %v2801_v57  ;;  %v1392_v2 = vand.u32 2, %v1360_v36 }
 0x14a   :  { %v595_v19 = vmul.f32 %v2840_v52, %v2840_v52  ;;  %v2859_v41 = vmul.f32 %v785_v29, %v2767_v39  ;;  %v430_v27 = vadd.f32 %v398_v35, %v2181_v1  ;;  %v1297_v37 = vand.u32 2, %v1810_v58 }
 0x14b   :  { %1898 = vrsqrt.f32 %v2848_v10  ;;  %v722_v33 = vadd.f32 -0.16666667, %v690_v61  ;;  %v1751_v51 = vround.rtne.f32 %v2852_v30  ;;  %v1361_v12 = vadd.s32 1, %v1810_v58 }
 0x14c   :  { %v627_v53 = vmul.f32 -0.0001984127, %v595_v19  ;;  %v849_v14 = vmul.f32 %v2859_v41, %v2859_v41  ;;  %v2867_v55 = vcvt.f32.s32 %v2777_v23  ;;  %v2873_v57 = vadd.f32 %v2790_v26, %v430_v27 }
 0x14d   :  { %v754_v47 = vmul.f32 %v722_v33, %v594_v60  ;;  %v532_v39 = vsub.f32 %v2852_v30, %v1751_v51  ;;  %vm2875_vm7 = vcmp.ne.s32.totalorder %v1168_v48, 0  ;;  %v1328_v22 = vshll.u32 %v1296_v18, 30  ;;  %v326_v60 = vpop.permute.xlu0 %325 }
 0x14e   :  { %v659_v15 = vadd.f32 0.008333333, %v627_v53  ;;  %v2870_v40 = vsub.f32 1.0, %v849_v14  ;;  %v1424_v54 = vshll.u32 %v1392_v2, 30  ;;  %v1169_v23 = vand.u32 1, %v1810_v58 }
 0x14f   :  { %v786_v1 = vadd.f32 1.0, %v754_v47  ;;  %v2879_v20 = vmul.f32 1.5707964, %v532_v39  ;;  %v2882_v31 = vshll.u32 %v1297_v37, 30  ;;  %v1393_v63 = vand.u32 2, %v1361_v12 }
 0x150   :  { %v691_v62 = vmul.f32 %v659_v15, %v595_v19  ;;  %1900 = vrsqrt.f32 %v2870_v40  ;;  %v1170_v21 = vand.u32 1, %v2867_v55  ;;  %v1298_v34 = vand.u32 2, %v2867_v55 }
 0x151   :  { %v2885_v11 = vmul.f32 %v786_v1, %v2806_v17  ;;  %v596_v59 = vmul.f32 %v2879_v20, %v2879_v20  ;;  %v2892_v28 = vadd.s32 1, %v2867_v55  ;;  %v1752_v42 = vround.rtne.f32 %v2873_v57 }
 0x152   :  { %v723_v49 = vadd.f32 -0.16666667, %v691_v62  ;;  %v399_v56 = vmul.f32 %v2845_v45, %v326_v60  ;;  %v2899_v50 = vcvt.f32.s32 %v2793_v46  ;;  %vm992_vm8 = vcmp.eq.f32.partialorder %v2848_v10, inf }
 0x153   :  { %v850_v17 = vmul.f32 %v2885_v11, %v2885_v11  ;;  %v628_v16 = vmul.f32 -0.0001984127, %v596_v59  ;;  %vm994_vm9 = vcmp.eq.f32.partialorder %v2848_v10, 0.0  ;;  %v533_v7 = vsub.f32 %v2873_v57, %v1752_v42 }
 0x154   :  { %v755_v13 = vmul.f32 %v723_v49, %v595_v19  ;;  %v995_v44 = vand.u32 2147483648, %v2848_v10  ;;  %vm2909_vm10 = vcmp.ne.s32.totalorder %v1169_v23, 0  ;;  %v431_v29 = vadd.f32 %v399_v56, %v2178_v0 }
 0x155   :  { %v1899_v43 = vpop.eup %1898  ;;  %v2906_v38 = vsub.f32 1.0, %v850_v17  ;;  %v660_v36 = vadd.f32 0.008333333, %v628_v16  ;;  %v2913_v35 = vmul.f32 1.5707964, %v533_v7  ;;  %v400_v58 = vmul.f32 %v2845_v45, %v330_v25  ;;  %v334_v7 = vpop.permute.xlu0 %333 }
 0x156   :  { %v991_v24 = vmul.f32 %v1899_v43, %v2848_v10  ;;  %v787_v32 = vadd.f32 1.0, %v755_v13  ;;  %v1425_v19 = vshll.u32 %v1393_v63, 30  ;;  %v2918_v48 = vshll.u32 %v1298_v34, 30 }
 0x157   :  { %1902 = vrsqrt.f32 %v2906_v38  ;;  %v1394_v53 = vand.u32 2, %v2892_v28  ;;  %v692_v2 = vmul.f32 %v660_v36, %v596_v59  ;;  %v597_v37 = vmul.f32 %v2913_v35, %v2913_v35 }
 0x158   :  { %v993_v6 = vsel %vm992_vm8, %v2848_v10, %v991_v24  ;;  %v2928_v0 = vmul.f32 %v787_v32, %v2840_v52  ;;  %v1299_v12 = vand.u32 2, %v2899_v50  ;;  %v2936_v47 = vadd.f32 %v2790_v26, %v431_v29 }
 0x159   :  { %v996_v61 = vsel %vm994_vm9, %v995_v44, %v993_v6  ;;  %v2941_v15 = vadd.s32 1, %v2899_v50  ;;  %v724_v55 = vadd.f32 -0.16666667, %v692_v2  ;;  %v629_v39 = vmul.f32 -0.0001984127, %v597_v37 }
 0x15a   :  { %v1232_v10 = vsel %vm2875_vm7, %v996_v61, %v2829_v8  ;;  %v1264_v33 = vsel %vm2875_vm7, %v2829_v8, %v996_v61  ;;  %v1901_v51 = vpop.eup %1900  ;;  %v851_v14 = vmul.f32 %v2928_v0, %v2928_v0  ;;  %v432_v8 = vadd.f32 %v400_v58, %v2187_v5 }
 0x15b   :  { %v1488_v27 = vxor.u32 %v1328_v22, %v1232_v10  ;;  %v1584_v18 = vxor.u32 %v1424_v54, %v1264_v33  ;;  %v998_v52 = vmul.f32 %v1901_v51, %v2870_v40  ;;  %vm999_vm11 = vcmp.eq.f32.partialorder %v2870_v40, inf }
 0x15c   :  { %v1002_v1 = vand.u32 2147483648, %v2870_v40  ;;  %v2945_v62 = vsub.f32 1.0, %v851_v14  ;;  %v1753_v3 = vround.rtne.f32 %v2936_v47  ;;  %vm1001_vm12 = vcmp.eq.f32.partialorder %v2870_v40, 0.0 }
 0x15d   :  { %1648 = vst [vmem:[#allocation2 + $0x68] sm:$0xff] %v1488_v27  ;;  %1680 = vst [vmem:[#allocation4 + $0x68] sm:$0xff] %v1584_v18  ;;  %v1000_v22 = vsel %vm999_vm11, %v2870_v40, %v998_v52  ;;  %vm2950_vm13 = vcmp.ne.s32.totalorder %v1170_v21, 0  ;;  %v756_v54 = vmul.f32 %v724_v55, %v596_v59  ;;  %v661_v60 = vadd.f32 0.008333333, %v629_v39 }
 0x15e   :  { %v1003_v23 = vsel %vm1001_vm12, %v1002_v1, %v1000_v22  ;;  %1904 = vrsqrt.f32 %v2945_v62  ;;  %v1171_v63 = vand.u32 1, %v2899_v50  ;;  %v2957_v49 = vadd.f32 %v2790_v26, %v432_v8 }
 0x15f   :  { %v1233_v34 = vsel %vm2909_vm10, %v1003_v23, %v2859_v41  ;;  %v1265_v40 = vsel %vm2909_vm10, %v2859_v41, %v1003_v23  ;;  %v788_v21 = vadd.f32 1.0, %v756_v54  ;;  %v2966_v59 = vcvt.f32.s32 %v2852_v30 }
 0x160   :  { %v1489_v28 = vxor.u32 %v2882_v31, %v1233_v34  ;;  %v1585_v42 = vxor.u32 %v1425_v19, %v1265_v40  ;;  %v693_v56 = vmul.f32 %v661_v60, %v597_v37  ;;  %v534_v43 = vsub.f32 %v2936_v47, %v1753_v3  ;;  %v338_v40 = vpop.permute.xlu1 %337 }
 0x161   :  { %v1903_v17 = vpop.eup %1902  ;;  %v1426_v13 = vshll.u32 %v1394_v53, 30  ;;  %v1331_v50 = vshll.u32 %v1299_v12, 30  ;;  %v1395_v16 = vand.u32 2, %v2941_v15  ;;  %v2972_v25 = vmul.f32 %v788_v21, %v2879_v20 }
 0x162   :  { %1649 = vst [vmem:[#allocation2 + $0x70] sm:$0xff] %v1489_v28  ;;  %1681 = vst [vmem:[#allocation4 + $0x70] sm:$0xff] %v1585_v42  ;;  %v1005_v41 = vmul.f32 %v1903_v17, %v2906_v38  ;;  %v725_v30 = vadd.f32 -0.16666667, %v693_v56  ;;  %v2975_v24 = vmul.f32 1.5707964, %v534_v43  ;;  %v1754_v31 = vround.rtne.f32 %v2957_v49 }
 0x163   :  { %vm1006_vm14 = vcmp.eq.f32.partialorder %v2906_v38, inf  ;;  %v1009_v44 = vand.u32 2147483648, %v2906_v38  ;;  %v852_v32 = vmul.f32 %v2972_v25, %v2972_v25  ;;  %v1172_v20 = vand.u32 1, %v2966_v59 }
 0x164   :  { %v1007_v36 = vsel %vm1006_vm14, %v2906_v38, %v1005_v41  ;;  %vm1008_vm15 = vcmp.eq.f32.partialorder %v2906_v38, 0.0  ;;  %vm2985_vm0 = vcmp.ne.s32.totalorder %v1171_v63, 0  ;;  %v757_v46 = vmul.f32 %v725_v30, %v597_v37 }
 0x165   :  { %v598_v29 = vmul.f32 %v2975_v24, %v2975_v24  ;;  %v1010_v58 = vsel %vm1008_vm15, %v1009_v44, %v1007_v36  ;;  %v2991_v61 = vsub.f32 1.0, %v852_v32  ;;  %v535_v19 = vsub.f32 %v2957_v49, %v1754_v31 }
 0x166   :  { %v401_v10 = vmul.f32 %v2845_v45, %v334_v7  ;;  %v1234_v33 = vsel %vm2950_vm13, %v1010_v58, %v2885_v11  ;;  %v1266_v38 = vsel %vm2950_vm13, %v2885_v11, %v1010_v58  ;;  %v789_v53 = vadd.f32 1.0, %v757_v46 }
 0x167   :  { %v630_v27 = vmul.f32 -0.0001984127, %v598_v29  ;;  %v1490_v18 = vxor.u32 %v2918_v48, %v1234_v33  ;;  %v1586_v2 = vxor.u32 %v1426_v13, %v1266_v38  ;;  %1906 = vrsqrt.f32 %v2991_v61 }
 0x168   :  { %v1364_v37 = vadd.s32 1, %v2966_v59  ;;  %v1905_v51 = vpop.eup %1904  ;;  %v1300_v14 = vand.u32 2, %v2966_v59  ;;  %v3006_v12 = vmul.f32 %v789_v53, %v2913_v35  ;;  %v1822_v8 = vcvt.f32.s32 %v2873_v57 }
 0x169   :  { %v662_v52 = vadd.f32 0.008333333, %v630_v27  ;;  %1650 = vst [vmem:[#allocation2 + $0x78] sm:$0xff] %v1490_v18  ;;  %1682 = vst [vmem:[#allocation4 + $0x78] sm:$0xff] %v1586_v2  ;;  %v1012_v11 = vmul.f32 %v1905_v51, %v2945_v62  ;;  %vm1013_vm1 = vcmp.eq.f32.partialorder %v2945_v62, inf  ;;  %v1427_v48 = vshll.u32 %v1395_v16, 30 }
 0x16a   :  { %v3011_v15 = vmul.f32 1.5707964, %v535_v19  ;;  %v1016_v55 = vand.u32 2147483648, %v2945_v62  ;;  %v853_v39 = vmul.f32 %v3006_v12, %v3006_v12  ;;  %v433_v35 = vadd.f32 %v401_v10, %v2184_v4 }
 0x16b   :  { %v694_v1 = vmul.f32 %v662_v52, %v598_v29  ;;  %v1014_v57 = vsel %vm1013_vm1, %v2945_v62, %v1012_v11  ;;  %vm1015_vm2 = vcmp.eq.f32.partialorder %v2945_v62, 0.0  ;;  %v1396_v3 = vand.u32 2, %v1364_v37 }
 0x16c   :  { %v599_v22 = vmul.f32 %v3011_v15, %v3011_v15  ;;  %v1017_v5 = vsel %vm1015_vm2, %v1016_v55, %v1014_v57  ;;  %v3021_v54 = vsub.f32 1.0, %v853_v39  ;;  %v1365_v60 = vadd.s32 1, %v1822_v8 }
 0x16d   :  { %v726_v23 = vadd.f32 -0.16666667, %v694_v1  ;;  %v1235_v63 = vsel %vm2985_vm0, %v1017_v5, %v2928_v0  ;;  %v1267_v4 = vsel %vm2985_vm0, %v2928_v0, %v1017_v5  ;;  %v3030_v62 = vadd.f32 %v2790_v26, %v433_v35  ;;  %v346_v1 = vpop.permute.xlu1 %345 }
 0x16e   :  { %v631_v34 = vmul.f32 -0.0001984127, %v599_v22  ;;  %v1491_v21 = vxor.u32 %v1331_v50, %v1235_v63  ;;  %v1587_v59 = vxor.u32 %v1427_v48, %v1267_v4  ;;  %1908 = vrsqrt.f32 %v3021_v54 }
 0x16f   :  { %v1301_v28 = vand.u32 2, %v1822_v8  ;;  %vm3033_vm3 = vcmp.ne.s32.totalorder %v1172_v20, 0  ;;  %v1332_v56 = vshll.u32 %v1300_v14, 30  ;;  %v758_v43 = vmul.f32 %v726_v23, %v598_v29 }
 0x170   :  { %v663_v17 = vadd.f32 0.008333333, %v631_v34  ;;  %1651 = vst [vmem:[#allocation2 + $0x80] sm:$0xff] %v1491_v21  ;;  %1683 = vst [vmem:[#allocation4 + $0x80] sm:$0xff] %v1587_v59  ;;  %v1173_v0 = vand.u32 1, %v1822_v8  ;;  %v1397_v13 = vand.u32 2, %v1365_v60  ;;  %v1755_v16 = vround.rtne.f32 %v3030_v62 }
 0x171   :  { %v402_v41 = vmul.f32 %v2845_v45, %v338_v40  ;;  %v1907_v50 = vpop.eup %1906  ;;  %v1428_v30 = vshll.u32 %v1396_v3, 30  ;;  %v790_v31 = vadd.f32 1.0, %v758_v43  ;;  %v3040_v7 = vcvt.f32.s32 %v2936_v47 }
 0x172   :  { %v695_v44 = vmul.f32 %v663_v17, %v599_v22  ;;  %v1019_v32 = vmul.f32 %v1907_v50, %v2991_v61  ;;  %vm1020_vm4 = vcmp.eq.f32.partialorder %v2991_v61, inf  ;;  %v1333_v20 = vshll.u32 %v1301_v28, 30  ;;  %v3562_v50 = vld [vmem:[#allocation10_spill] sm:$0xff] }
 0x173   :  { %v536_v36 = vsub.f32 %v3030_v62, %v1755_v16  ;;  %v1023_v6 = vand.u32 2147483648, %v2991_v61  ;;  %v3047_v46 = vmul.f32 %v790_v31, %v2975_v24  ;;  %v434_v58 = vadd.f32 %v402_v41, %v2193_v9  ;;  %v3561_v16 = vld [vmem:[#allocation8_spill] sm:$0xff] }
 0x174   :  { %v727_v29 = vadd.f32 -0.16666667, %v695_v44  ;;  %v1021_v19 = vsel %vm1020_vm4, %v2991_v61, %v1019_v32  ;;  %vm1022_vm5 = vcmp.eq.f32.partialorder %v2991_v61, 0.0  ;;  %vm3052_vm6 = vcmp.ne.s32.totalorder %v1173_v0, 0 }
 0x175   :  { %v1429_v10 = vshll.u32 %v1397_v13, 30  ;;  %v3056_v33 = vmul.f32 1.5707964, %v536_v36  ;;  %v1024_v38 = vsel %vm1022_vm5, %v1023_v6, %v1021_v19  ;;  %v854_v53 = vmul.f32 %v3047_v46, %v3047_v46 }
 0x176   :  { %v1174_v24 = vand.u32 1, %v3040_v7  ;;  %v759_v27 = vmul.f32 %v727_v29, %v599_v22  ;;  %v1236_v9 = vsel %vm3033_vm3, %v1024_v38, %v2972_v25  ;;  %v1268_v61 = vsel %vm3033_vm3, %v2972_v25, %v1024_v38  ;;  %v342_v25 = vpop.permute.xlu0 %341 }
 0x177   :  { %v600_v18 = vmul.f32 %v3056_v33, %v3056_v33  ;;  %v3070_v2 = vadd.f32 %v2790_v26, %v434_v58  ;;  %v1492_v37 = vxor.u32 %v1332_v56, %v1236_v9  ;;  %v1588_v51 = vxor.u32 %v1428_v30, %v1268_v61 }
 0x178   :  { %v3072_v14 = vsub.f32 1.0, %v854_v53  ;;  %v791_v8 = vadd.f32 1.0, %v759_v27  ;;  %v1909_v52 = vpop.eup %1908  ;;  %v1302_v11 = vand.u32 2, %v3040_v7  ;;  %v1366_v48 = vadd.s32 1, %v3040_v7 }
 0x179   :  { %v632_v55 = vmul.f32 -0.0001984127, %v600_v18  ;;  %v1756_v39 = vround.rtne.f32 %v3070_v2  ;;  %1652 = vst [vmem:[#allocation2 + $0x88] sm:$0xff] %v1492_v37  ;;  %1684 = vst [vmem:[#allocation4 + $0x88] sm:$0xff] %v1588_v51  ;;  %v1026_v35 = vmul.f32 %v1909_v52, %v3021_v54  ;;  %vm1027_vm7 = vcmp.eq.f32.partialorder %v3021_v54, inf }
 0x17a   :  { %1910 = vrsqrt.f32 %v3072_v14  ;;  %v1828_v57 = vcvt.f32.s32 %v2957_v49  ;;  %v1030_v3 = vand.u32 2147483648, %v3021_v54  ;;  %v3083_v22 = vmul.f32 %v791_v8, %v3011_v15  ;;  %v350_v51 = vpop.permute.xlu0 %349 }
 0x17b   :  { %v664_v5 = vadd.f32 0.008333333, %v632_v55  ;;  %v537_v60 = vsub.f32 %v3070_v2, %v1756_v39  ;;  %v1028_v23 = vsel %vm1027_vm7, %v3021_v54, %v1026_v35  ;;  %vm1029_vm8 = vcmp.eq.f32.partialorder %v3021_v54, 0.0 }
 0x17c   :  { %v403_v63 = vmul.f32 %v2845_v45, %v342_v25  ;;  %v404_v4 = vmul.f32 %v2845_v45, %v346_v1  ;;  %v1031_v34 = vsel %vm1029_vm8, %v1030_v3, %v1028_v23  ;;  %v855_v49 = vmul.f32 %v3083_v22, %v3083_v22 }
 0x17d   :  { %v696_v40 = vmul.f32 %v664_v5, %v600_v18  ;;  %v3092_v21 = vmul.f32 1.5707964, %v537_v60  ;;  %v1237_v15 = vsel %vm3052_vm6, %v1031_v34, %v3006_v12  ;;  %v1269_v59 = vsel %vm3052_vm6, %v3006_v12, %v1031_v34 }
 0x17e   :  { %v1398_v54 = vand.u32 2, %v1366_v48  ;;  %v1303_v28 = vand.u32 2, %v1828_v57  ;;  %v1493_v42 = vxor.u32 %v1333_v20, %v1237_v15  ;;  %v1589_v56 = vxor.u32 %v1429_v10, %v1269_v59  ;;  %v354_v59 = vpop.permute.xlu1 %353 }
 0x17f   :  { %v3100_v43 = vsub.f32 1.0, %v855_v49  ;;  %v728_v17 = vadd.f32 -0.16666667, %v696_v40  ;;  %v1367_v0 = vadd.s32 1, %v1828_v57  ;;  %v601_v13 = vmul.f32 %v3092_v21, %v3092_v21 }
 0x180   :  { %v435_v41 = vadd.f32 %v403_v63, %v3561_v16  ;;  %v436_v30 = vadd.f32 %v404_v4, %v3562_v50  ;;  %1653 = vst [vmem:[#allocation2 + $0x90] sm:$0xff] %v1493_v42  ;;  %1685 = vst [vmem:[#allocation4 + $0x90] sm:$0xff] %v1589_v56  ;;  %vm3106_vm9 = vcmp.ne.s32.totalorder %v1174_v24, 0  ;;  %v3112_v12 = vcvt.f32.s32 %v3030_v62 }
 0x181   :  { %1912 = vrsqrt.f32 %v3100_v43  ;;  %v1334_v7 = vshll.u32 %v1302_v11, 30  ;;  %v760_v44 = vmul.f32 %v728_v17, %v600_v18  ;;  %v633_v32 = vmul.f32 -0.0001984127, %v601_v13 }
 0x182   :  { %v3115_v20 = vadd.f32 %v2790_v26, %v435_v41  ;;  %v1430_v36 = vshll.u32 %v1398_v54, 30  ;;  %v1175_v6 = vand.u32 1, %v1828_v57  ;;  %v1335_v29 = vshll.u32 %v1303_v28, 30 }
 0x183   :  { %v3118_v58 = vadd.f32 %v2790_v26, %v436_v30  ;;  %v1399_v47 = vand.u32 2, %v1367_v0  ;;  %v792_v10 = vadd.f32 1.0, %v760_v44  ;;  %v665_v38 = vadd.f32 0.008333333, %v633_v32  ;;  %v3567_v0 = vld [vmem:[#allocation9_spill] sm:$0xff] }
 0x184   :  { %v1911_v19 = vpop.eup %1910  ;;  %v1757_v53 = vround.rtne.f32 %v3115_v20  ;;  %vm1034_vm10 = vcmp.eq.f32.partialorder %v3072_v14, inf  ;;  %v3124_v24 = vadd.s32 1, %v3112_v12  ;;  %v1037_v9 = vand.u32 2147483648, %v3072_v14 }
 0x185   :  { %v1033_v62 = vmul.f32 %v1911_v19, %v3072_v14  ;;  %v1758_v27 = vround.rtne.f32 %v3118_v58  ;;  %v3129_v61 = vmul.f32 %v792_v10, %v3056_v33  ;;  %v697_v18 = vmul.f32 %v665_v38, %v601_v13  ;;  %v3570_v38 = vld [vmem:[#allocation12_spill] sm:$0xff] }
 0x186   :  { %v538_v37 = vsub.f32 %v3115_v20, %v1757_v53  ;;  %vm1036_vm11 = vcmp.eq.f32.partialorder %v3072_v14, 0.0  ;;  %vm3134_vm12 = vcmp.ne.s32.totalorder %v1175_v6, 0  ;;  %v3139_v11 = vcvt.f32.s32 %v3070_v2  ;;  %v358_v53 = vpop.permute.xlu0 %357 }
 0x187   :  { %v1035_v8 = vsel %vm1034_vm10, %v3072_v14, %v1033_v62  ;;  %v539_v48 = vsub.f32 %v3118_v58, %v1758_v27  ;;  %v856_v33 = vmul.f32 %v3129_v61, %v3129_v61  ;;  %v729_v39 = vadd.f32 -0.16666667, %v697_v18 }
 0x188   :  { %v1038_v55 = vsel %vm1036_vm11, %v1037_v9, %v1035_v8  ;;  %v3144_v25 = vmul.f32 1.5707964, %v538_v37  ;;  %v1431_v35 = vshll.u32 %v1399_v47, 30  ;;  %v405_v2 = vmul.f32 %v2845_v45, %v350_v51 }
 0x189   :  { %v1238_v14 = vsel %vm3106_vm9, %v1038_v55, %v3047_v46  ;;  %v1270_v1 = vsel %vm3106_vm9, %v3047_v46, %v1038_v55  ;;  %v3153_v5 = vsub.f32 1.0, %v856_v33  ;;  %v761_v60 = vmul.f32 %v729_v39, %v601_v13 }
 0x18a   :  { %v1494_v57 = vxor.u32 %v1334_v7, %v1238_v14  ;;  %v1590_v3 = vxor.u32 %v1430_v36, %v1270_v1  ;;  %v1176_v63 = vand.u32 1, %v3112_v12  ;;  %v1304_v4 = vand.u32 2, %v3112_v12 }
 0x18b   :  { %v1913_v23 = vpop.eup %1912  ;;  %v602_v34 = vmul.f32 %v3144_v25, %v3144_v25  ;;  %v3159_v49 = vmul.f32 1.5707964, %v539_v48  ;;  %1914 = vrsqrt.f32 %v3153_v5  ;;  %v1400_v40 = vand.u32 2, %v3124_v24 }
 0x18c   :  { %1654 = vst [vmem:[#allocation2 + $0x98] sm:$0xff] %v1494_v57  ;;  %1686 = vst [vmem:[#allocation4 + $0x98] sm:$0xff] %v1590_v3  ;;  %v1040_v46 = vmul.f32 %v1913_v23, %v3100_v43  ;;  %v1305_v15 = vand.u32 2, %v3139_v11  ;;  %vm1041_vm13 = vcmp.eq.f32.partialorder %v3100_v43, inf  ;;  %v1044_v54 = vand.u32 2147483648, %v3100_v43 }
 0x18d   :  { %v793_v28 = vadd.f32 1.0, %v761_v60  ;;  %v634_v42 = vmul.f32 -0.0001984127, %v602_v34  ;;  %vm1043_vm14 = vcmp.eq.f32.partialorder %v3100_v43, 0.0  ;;  %v603_v17 = vmul.f32 %v3159_v49, %v3159_v49 }
 0x18e   :  { %v1042_v56 = vsel %vm1041_vm13, %v3100_v43, %v1040_v46  ;;  %v437_v13 = vadd.f32 %v405_v2, %v3567_v0  ;;  %v406_v30 = vmul.f32 %v2845_v45, %v354_v59  ;;  %v1369_v12 = vadd.s32 1, %v3139_v11 }
 0x18f   :  { %v1045_v16 = vsel %vm1043_vm14, %v1044_v54, %v1042_v56  ;;  %v3173_v41 = vmul.f32 %v793_v28, %v3092_v21  ;;  %v666_v50 = vadd.f32 0.008333333, %v634_v42  ;;  %v635_v7 = vmul.f32 -0.0001984127, %v603_v17 }
 0x190   :  { %v1239_v31 = vsel %vm3134_vm12, %v1045_v16, %v3083_v22  ;;  %v1271_v43 = vsel %vm3134_vm12, %v3083_v22, %v1045_v16  ;;  %v3186_v19 = vadd.f32 %v2790_v26, %v437_v13  ;;  %vm3188_vm15 = vcmp.ne.s32.totalorder %v1176_v63, 0 }
 0x191   :  { %v1495_v44 = vxor.u32 %v1335_v29, %v1239_v31  ;;  %v1591_v32 = vxor.u32 %v1431_v35, %v1271_v43  ;;  %v857_v21 = vmul.f32 %v3173_v41, %v3173_v41  ;;  %v698_v36 = vmul.f32 %v666_v50, %v602_v34  ;;  %v3573_v50 = vld [vmem:[#allocation11_spill] sm:$0xff] }
 0x192   :  { %v667_v6 = vadd.f32 0.008333333, %v635_v7  ;;  %v438_v29 = vadd.f32 %v406_v30, %v3570_v38  ;;  %v1336_v62 = vshll.u32 %v1304_v4, 30  ;;  %v1432_v24 = vshll.u32 %v1400_v40, 30 }
 0x193   :  { %1655 = vst [vmem:[#allocation2 + $0xa0] sm:$0xff] %v1495_v44  ;;  %1687 = vst [vmem:[#allocation4 + $0xa0] sm:$0xff] %v1591_v32  ;;  %v3192_v22 = vsub.f32 1.0, %v857_v21  ;;  %v730_v10 = vadd.f32 -0.16666667, %v698_v36  ;;  %v1759_v9 = vround.rtne.f32 %v3186_v19  ;;  %v1177_v18 = vand.u32 1, %v3139_v11 }
 0x194   :  { %v699_v27 = vmul.f32 %v667_v6, %v603_v17  ;;  %v3198_v37 = vshll.u32 %v1305_v15, 30  ;;  %v1401_v51 = vand.u32 2, %v1369_v12  ;;  %v407_v33 = vmul.f32 %v2845_v45, %v358_v53  ;;  %v362_v15 = vpop.permute.xlu1 %361  ;;  %v3574_v53 = vld [vmem:[#allocation14_spill] sm:$0xff] }
 0x195   :  { %1916 = vrsqrt.f32 %v3192_v22  ;;  %v1915_v8 = vpop.eup %1914  ;;  %v762_v52 = vmul.f32 %v730_v10, %v602_v34  ;;  %v540_v55 = vsub.f32 %v3186_v19, %v1759_v9  ;;  %vm1048_vm0 = vcmp.eq.f32.partialorder %v3153_v5, inf }
 0x196   :  { %v731_v48 = vadd.f32 -0.16666667, %v699_v27  ;;  %v1047_v39 = vmul.f32 %v1915_v8, %v3153_v5  ;;  %v3205_v14 = vcvt.f32.s32 %v3115_v20  ;;  %v3208_v1 = vadd.f32 %v2790_v26, %v438_v29 }
 0x197   :  { %v1051_v11 = vand.u32 2147483648, %v3153_v5  ;;  %v794_v35 = vadd.f32 1.0, %v762_v52  ;;  %v3211_v57 = vmul.f32 1.5707964, %v540_v55  ;;  %vm1050_vm1 = vcmp.eq.f32.partialorder %v3153_v5, 0.0 }
 0x198   :  { %v763_v2 = vmul.f32 %v731_v48, %v603_v17  ;;  %v1049_v3 = vsel %vm1048_vm0, %v3153_v5, %v1047_v39  ;;  %v3216_v60 = vcvt.f32.s32 %v3118_v58  ;;  %v1760_v23 = vround.rtne.f32 %v3208_v1 }
 0x199   :  { %v1052_v20 = vsel %vm1050_vm1, %v1051_v11, %v1049_v3  ;;  %v3220_v63 = vmul.f32 %v794_v35, %v3144_v25  ;;  %v604_v34 = vmul.f32 %v3211_v57, %v3211_v57  ;;  %vm3230_vm2 = vcmp.ne.s32.totalorder %v1177_v18, 0  ;;  %v366_v35 = vpop.permute.xlu0 %365 }
 0x19a   :  { %v795_v4 = vadd.f32 1.0, %v763_v2  ;;  %v1240_v46 = vsel %vm3188_vm15, %v1052_v20, %v3129_v61  ;;  %v1272_v5 = vsel %vm3188_vm15, %v3129_v61, %v1052_v20  ;;  %v1370_v40 = vadd.s32 1, %v3205_v14 }
 0x19b   :  { %v541_v25 = vsub.f32 %v3208_v1, %v1760_v23  ;;  %v1496_v59 = vxor.u32 %v1336_v62, %v1240_v46  ;;  %v1592_v54 = vxor.u32 %v1432_v24, %v1272_v5  ;;  %v858_v28 = vmul.f32 %v3220_v63, %v3220_v63 }
 0x19c   :  { %v3239_v42 = vmul.f32 %v795_v4, %v3159_v49  ;;  %v1433_v56 = vshll.u32 %v1401_v51, 30  ;;  %v1178_v61 = vand.u32 1, %v3205_v14  ;;  %v636_v17 = vmul.f32 -0.0001984127, %v604_v34 }
 0x19d   :  { %v3242_v0 = vmul.f32 1.5707964, %v541_v25  ;;  %1656 = vst [vmem:[#allocation2 + $0xa8] sm:$0xff] %v1496_v59  ;;  %1688 = vst [vmem:[#allocation4 + $0xa8] sm:$0xff] %v1592_v54  ;;  %v3244_v13 = vsub.f32 1.0, %v858_v28  ;;  %v439_v30 = vadd.f32 %v407_v33, %v3573_v50  ;;  %v408_v31 = vmul.f32 %v2845_v45, %v362_v15 }
 0x19e   :  { %v859_v16 = vmul.f32 %v3239_v42, %v3239_v42  ;;  %v1306_v49 = vand.u32 2, %v3205_v14  ;;  %v1402_v12 = vand.u32 2, %v1370_v40  ;;  %v668_v7 = vadd.f32 0.008333333, %v636_v17 }
 0x19f   :  { %v1917_v43 = vpop.eup %1916  ;;  %v605_v44 = vmul.f32 %v3242_v0, %v3242_v0  ;;  %vm1055_vm3 = vcmp.eq.f32.partialorder %v3192_v22, inf  ;;  %1918 = vrsqrt.f32 %v3244_v13  ;;  %v1371_v21 = vadd.s32 1, %v3216_v60 }
 0x1a0   :  { %v1054_v32 = vmul.f32 %v1917_v43, %v3192_v22  ;;  %v1058_v36 = vand.u32 2147483648, %v3192_v22  ;;  %v3258_v6 = vsub.f32 1.0, %v859_v16  ;;  %v700_v47 = vmul.f32 %v668_v7, %v604_v34  ;;  %v370_v7 = vpop.permute.xlu1 %369 }
 0x1a1   :  { %v637_v10 = vmul.f32 -0.0001984127, %v605_v44  ;;  %vm1057_vm4 = vcmp.eq.f32.partialorder %v3192_v22, 0.0  ;;  %v3263_v29 = vadd.f32 %v2790_v26, %v439_v30  ;;  %v440_v62 = vadd.f32 %v408_v31, %v3574_v53 }
 0x1a2   :  { %v1056_v38 = vsel %vm1055_vm3, %v3192_v22, %v1054_v32  ;;  %1920 = vrsqrt.f32 %v3258_v6  ;;  %v1179_v27 = vand.u32 1, %v3216_v60  ;;  %v1307_v9 = vand.u32 2, %v3216_v60 }
 0x1a3   :  { %v1059_v24 = vsel %vm1057_vm4, %v1058_v36, %v1056_v38  ;;  %v1403_v51 = vand.u32 2, %v1371_v21  ;;  %v732_v8 = vadd.f32 -0.16666667, %v700_v47  ;;  %v3277_v55 = vcvt.f32.s32 %v3186_v19 }
 0x1a4   :  { %v1241_v18 = vsel %vm3230_vm2, %v1059_v24, %v3173_v41  ;;  %v1273_v22 = vsel %vm3230_vm2, %v3173_v41, %v1059_v24  ;;  %v669_v33 = vadd.f32 0.008333333, %v637_v10  ;;  %v1761_v14 = vround.rtne.f32 %v3263_v29 }
 0x1a5   :  { %v1497_v52 = vxor.u32 %v3198_v37, %v1241_v18  ;;  %v1593_v48 = vxor.u32 %v1433_v56, %v1273_v22  ;;  %v764_v39 = vmul.f32 %v732_v8, %v604_v34  ;;  %v3281_v11 = vadd.f32 %v2790_v26, %v440_v62 }
 0x1a6   :  { %vm3283_vm5 = vcmp.ne.s32.totalorder %v1178_v61, 0  ;;  %v1338_v2 = vshll.u32 %v1306_v49, 30  ;;  %v1434_v37 = vshll.u32 %v1402_v12, 30  ;;  %v701_v3 = vmul.f32 %v669_v33, %v605_v44 }
 0x1a7   :  { %1657 = vst [vmem:[#allocation2 + $0xb0] sm:$0xff] %v1497_v52  ;;  %1689 = vst [vmem:[#allocation4 + $0xb0] sm:$0xff] %v1593_v48  ;;  %v1339_v60 = vshll.u32 %v1307_v9, 30  ;;  %v1435_v19 = vshll.u32 %v1403_v51, 30  ;;  %v796_v23 = vadd.f32 1.0, %v764_v39  ;;  %v542_v20 = vsub.f32 %v3263_v29, %v1761_v14  ;;  %v3580_v39 = vld [vmem:[#allocation16_spill] sm:$0xff] }
 0x1a8   :  { %vm3288_vm6 = vcmp.ne.s32.totalorder %v1179_v27, 0  ;;  %v3293_v26 = vadd.s32 1, %v3277_v55  ;;  %v733_v34 = vadd.f32 -0.16666667, %v701_v3  ;;  %v1762_v46 = vround.rtne.f32 %v3281_v11 }
 0x1a9   :  { %v409_v5 = vmul.f32 %v2845_v45, %v366_v35  ;;  %v1919_v58 = vpop.eup %1918  ;;  %vm1062_vm7 = vcmp.eq.f32.partialorder %v3244_v13, inf  ;;  %vm1064_vm8 = vcmp.eq.f32.partialorder %v3244_v13, 0.0  ;;  %v3300_v40 = vmul.f32 %v796_v23, %v3211_v57 }
 0x1aa   :  { %v3302_v25 = vmul.f32 1.5707964, %v542_v20  ;;  %v1061_v15 = vmul.f32 %v1919_v58, %v3244_v13  ;;  %v1065_v59 = vand.u32 2147483648, %v3244_v13  ;;  %v765_v54 = vmul.f32 %v733_v34, %v605_v44 }
 0x1ab   :  { %v543_v28 = vsub.f32 %v3281_v11, %v1762_v46  ;;  %vm1069_vm9 = vcmp.eq.f32.partialorder %v3258_v6, inf  ;;  %vm1071_vm10 = vcmp.eq.f32.partialorder %v3258_v6, 0.0  ;;  %v860_v56 = vmul.f32 %v3300_v40, %v3300_v40 }
 0x1ac   :  { %v606_v57 = vmul.f32 %v3302_v25, %v3302_v25  ;;  %v1921_v61 = vpop.eup %1920  ;;  %v1063_v17 = vsel %vm1062_vm7, %v3244_v13, %v1061_v15  ;;  %v1072_v16 = vand.u32 2147483648, %v3258_v6  ;;  %v797_v50 = vadd.f32 1.0, %v765_v54 }
 0x1ad   :  { %v3315_v30 = vmul.f32 1.5707964, %v543_v28  ;;  %v1066_v31 = vsel %vm1064_vm8, %v1065_v59, %v1063_v17  ;;  %v1068_v43 = vmul.f32 %v1921_v61, %v3258_v6  ;;  %v3320_v49 = vsub.f32 1.0, %v860_v56  ;;  %v374_v17 = vpop.permute.xlu0 %373 }
 0x1ae   :  { %v638_v12 = vmul.f32 -0.0001984127, %v606_v57  ;;  %v1242_v44 = vsel %vm3283_vm5, %v1066_v31, %v3220_v63  ;;  %v1274_v32 = vsel %vm3283_vm5, %v3220_v63, %v1066_v31  ;;  %v3329_v21 = vmul.f32 %v797_v50, %v3242_v0  ;;  %v3579_v63 = vld [vmem:[#allocation13_spill] sm:$0xff] }
 0x1af   :  { %v607_v13 = vmul.f32 %v3315_v30, %v3315_v30  ;;  %v1498_v36 = vxor.u32 %v1338_v2, %v1242_v44  ;;  %v1594_v47 = vxor.u32 %v1434_v37, %v1274_v32  ;;  %v1070_v10 = vsel %vm1069_vm9, %v3258_v6, %v1068_v43 }
 0x1b0   :  { %1922 = vrsqrt.f32 %v3320_v49  ;;  %v1073_v38 = vsel %vm1071_vm10, %v1072_v16, %v1070_v10  ;;  %v1846_v53 = vcvt.f32.s32 %v3208_v1  ;;  %v441_v62 = vadd.f32 %v409_v5, %v3579_v63 }
 0x1b1   :  { %v410_v0 = vmul.f32 %v2845_v45, %v370_v7  ;;  %1658 = vst [vmem:[#allocation2 + $0xb8] sm:$0xff] %v1498_v36  ;;  %1690 = vst [vmem:[#allocation4 + $0xb8] sm:$0xff] %v1594_v47  ;;  %v1243_v24 = vsel %vm3288_vm6, %v1073_v38, %v3239_v42  ;;  %v1275_v27 = vsel %vm3288_vm6, %v3239_v42, %v1073_v38  ;;  %v670_v9 = vadd.f32 0.008333333, %v638_v12  ;;  %v3357_v42 = vld [vmem:[%s3509_s2] ss:$0 sm:$0xff] }
 0x1b2   :  { %v861_v6 = vmul.f32 %v3329_v21, %v3329_v21  ;;  %v1499_v18 = vxor.u32 %v1339_v60, %v1243_v24  ;;  %v1595_v1 = vxor.u32 %v1435_v19, %v1275_v27  ;;  %v639_v22 = vmul.f32 -0.0001984127, %v607_v13  ;;  %v1939_v36 = vld [vmem:[%s3508_s1 + $0x1] ss:$0 sm:$0xff]  ;;  %s1990_s1 = smov [#allocation2]  }
 0x1b3   :  { %v1180_v51 = vand.u32 1, %v3277_v55  ;;  %v702_v8 = vmul.f32 %v670_v9, %v606_v57  ;;  %v1308_v52 = vand.u32 2, %v3277_v55  ;;  %v3360_v33 = vadd.f32 %v3357_v42, %v441_v62  ;;  %s1704_s13 = sshll.u32 %s1990_s1, 4  ;;  %s1705_s13 = int_to_ptr.vmem [resolvable:$true] %s1704_s13 }
 0x1b4   :  { %v3351_v45 = vsub.f32 1.0, %v861_v6  ;;  %1659 = vst [vmem:[#allocation2 + $0xc0] sm:$0xff] %v1499_v18  ;;  %1691 = vst [vmem:[#allocation4 + $0xc0] sm:$0xff] %v1595_v1  ;;  %v671_v48 = vadd.f32 0.008333333, %v639_v22  ;;  %v442_v14 = vadd.f32 %v410_v0, %v3580_v39  ;;  %v1404_v35 = vand.u32 2, %v3293_v26  ;;  %p1945_p1 = scmp.lt.s32.totalorder %s1705_s13, %s1705_s13 }
 0x1b5   :  { %v1309_v41 = vand.u32 2, %v1846_v53  ;;  %v1373_v2 = vadd.s32 1, %v1846_v53  ;;  %v734_v37 = vadd.f32 -0.16666667, %v702_v8  ;;  %v1763_v55 = vround.rtne.f32 %v3360_v33  ;;  %s1940_s16 = scalar_lea.vmem %s1705_s13, 4096 }
 0x1b6   :  { %1924 = vrsqrt.f32 %v3351_v45  ;;  %v703_v3 = vmul.f32 %v671_v48, %v607_v13  ;;  %vm3366_vm11 = vcmp.ne.s32.totalorder %v1180_v51, 0  ;;  %v1181_v19 = vand.u32 1, %v1846_v53  ;;  %v3585_v48 = vld [vmem:[#allocation15_spill] sm:$0xff]  ;;  %p1941_p0 = scmp.ne.s32.totalorder %s1705_s13, %s1940_s16  ;;  %p1946_p2 = scmp.lt.s32.totalorder %s1940_s16, %s1940_s16 }
 0x1b7   :  { %v3371_v23 = vadd.f32 %v3357_v42, %v442_v14  ;;  %v1340_v20 = vshll.u32 %v1308_v52, 30  ;;  %v766_v4 = vmul.f32 %v734_v37, %v606_v57  ;;  %v544_v26 = vsub.f32 %v3360_v33, %v1763_v55 }
 0x1b8   :  { %v735_v34 = vadd.f32 -0.16666667, %v703_v3  ;;  %v1436_v5 = vshll.u32 %v1404_v35, 30  ;;  %v1341_v58 = vshll.u32 %v1309_v41, 30  ;;  %v1405_v15 = vand.u32 2, %v1373_v2  ;;  %p1947_p3 = por %p1946_p2, %p1945_p1 }
 0x1b9   :  { %v1764_v59 = vround.rtne.f32 %v3371_v23  ;;  %v798_v28 = vadd.f32 1.0, %v766_v4  ;;  %v3376_v61 = vmul.f32 1.5707964, %v544_v26  ;;  %vm1076_vm12 = vcmp.eq.f32.partialorder %v3320_v49, inf }
 0x1ba   :  { %v1923_v46 = vpop.eup %1922  ;;  %v767_v56 = vmul.f32 %v735_v34, %v607_v13  ;;  %vm1078_vm13 = vcmp.eq.f32.partialorder %v3320_v49, 0.0  ;;  %v1079_v57 = vand.u32 2147483648, %v3320_v49  ;;  %vm3381_vm14 = vcmp.ne.s32.totalorder %v1181_v19, 0  ;;  %p1948_p4 = pnand %p1947_p3, %p1941_p0 }
 0x1bb   :  { %v1075_v54 = vmul.f32 %v1923_v46, %v3320_v49  ;;  %v545_v50 = vsub.f32 %v3371_v23, %v1764_v59  ;;  %v3388_v43 = vmul.f32 %v798_v28, %v3302_v25  ;;  %v608_v7 = vmul.f32 %v3376_v61, %v3376_v61 }
 0x1bc   :  { %v799_v12 = vadd.f32 1.0, %v767_v56  ;;  %v1849_v32 = vcvt.f32.s32 %v3263_v29  ;;  %v411_v47 = vmul.f32 %v1939_v36, %v374_v17  ;;  %v1437_v27 = vshll.u32 %v1405_v15, 30 }
 0x1bd   :  { %v1077_v31 = vsel %vm1076_vm12, %v3320_v49, %v1075_v54  ;;  %v3393_v13 = vmul.f32 1.5707964, %v545_v50  ;;  %v862_v10 = vmul.f32 %v3388_v43, %v3388_v43  ;;  %v640_v62 = vmul.f32 -0.0001984127, %v608_v7 }
 0x1be   :  { %v1080_v44 = vsel %vm1078_vm13, %v1079_v57, %v1077_v31  ;;  %v3407_v29 = vmul.f32 %v799_v12, %v3315_v30  ;;  %vm1083_vm15 = vcmp.eq.f32.partialorder %v3351_v45, inf  ;;  %v1086_v30 = vand.u32 2147483648, %v3351_v45 }
 0x1bf   :  { %v1244_v49 = vsel %vm3366_vm11, %v1080_v44, %v3300_v40  ;;  %v1276_v25 = vsel %vm3366_vm11, %v3300_v40, %v1080_v44  ;;  %v609_v0 = vmul.f32 %v3393_v13, %v3393_v13  ;;  %v894_v6 = vsub.f32 1.0, %v862_v10 }
 0x1c0   :  { %v1925_v38 = vpop.eup %1924  ;;  %v1500_v53 = vxor.u32 %v1340_v20, %v1244_v49  ;;  %v1596_v63 = vxor.u32 %v1436_v5, %v1276_v25  ;;  %v863_v40 = vmul.f32 %v3407_v29, %v3407_v29  ;;  %v672_v9 = vadd.f32 0.008333333, %v640_v62 }
 0x1c1   :  { %v1082_v24 = vmul.f32 %v1925_v38, %v3351_v45  ;;  %v641_v18 = vmul.f32 -0.0001984127, %v609_v0  ;;  %vm1085_vm0 = vcmp.eq.f32.partialorder %v3351_v45, 0.0  ;;  %1926 = vrsqrt.f32 %v894_v6 }
 0x1c2   :  { %1660 = vst [vmem:[#allocation2 + $0xc8] sm:$0xff] %v1500_v53  ;;  %1692 = vst [vmem:[#allocation4 + $0xc8] sm:$0xff] %v1596_v63  ;;  %v1374_v22 = vadd.s32 1, %v1849_v32  ;;  %v895_v8 = vsub.f32 1.0, %v863_v40  ;;  %v704_v52 = vmul.f32 %v672_v9, %v608_v7  ;;  %v443_v39 = vadd.f32 %v411_v47, %v3585_v48 }
 0x1c3   :  { %v1084_v1 = vsel %vm1083_vm15, %v3351_v45, %v1082_v24  ;;  %v1852_v41 = vcvt.f32.s32 %v3281_v11  ;;  %v673_v2 = vadd.f32 0.008333333, %v641_v18  ;;  %v1182_v60 = vand.u32 1, %v1849_v32 }
 0x1c4   :  { %v1087_v51 = vsel %vm1085_vm0, %v1086_v30, %v1084_v1  ;;  %1928 = vrsqrt.f32 %v895_v8  ;;  %v736_v3 = vadd.f32 -0.16666667, %v704_v52  ;;  %v1310_v19 = vand.u32 2, %v1849_v32 }
 0x1c5   :  { %v1245_v14 = vsel %vm3381_vm14, %v1087_v51, %v3329_v21  ;;  %v1277_v35 = vsel %vm3381_vm14, %v3329_v21, %v1087_v51  ;;  %v705_v55 = vmul.f32 %v673_v2, %v609_v0  ;;  %v3427_v20 = vadd.f32 %v3357_v42, %v443_v39 }
 0x1c6   :  { %v1501_v37 = vxor.u32 %v1341_v58, %v1245_v14  ;;  %v1597_v45 = vxor.u32 %v1437_v27, %v1277_v35  ;;  %v1406_v4 = vand.u32 2, %v1374_v22  ;;  %v1183_v34 = vand.u32 1, %v1852_v41 }
 0x1c7   :  { %v768_v26 = vmul.f32 %v736_v3, %v608_v7  ;;  %v737_v46 = vadd.f32 -0.16666667, %v705_v55  ;;  %v1375_v21 = vadd.s32 1, %v1852_v41  ;;  %v1765_v11 = vround.rtne.f32 %v3427_v20 }
 0x1c8   :  { %1661 = vst [vmem:[#allocation2 + $0xd0] sm:$0xff] %v1501_v37  ;;  %1693 = vst [vmem:[#allocation4 + $0xd0] sm:$0xff] %v1597_v45  ;;  %vm3430_vm1 = vcmp.ne.s32.totalorder %v1182_v60, 0  ;;  %v1342_v59 = vshll.u32 %v1310_v19, 30  ;;  %v1311_v54 = vand.u32 2, %v1852_v41  ;;  %v1438_v42 = vshll.u32 %v1406_v4, 30 }
 0x1c9   :  { %v800_v5 = vadd.f32 1.0, %v768_v26  ;;  %v769_v58 = vmul.f32 %v737_v46, %v609_v0  ;;  %v546_v28 = vsub.f32 %v3427_v20, %v1765_v11  ;;  %vm3435_vm2 = vcmp.ne.s32.totalorder %v1183_v34, 0 }
 0x1ca   :  { %vm1090_vm3 = vcmp.eq.f32.partialorder %v894_v6, inf  ;;  %v1407_v31 = vand.u32 2, %v1375_v21  ;;  %vm1092_vm4 = vcmp.eq.f32.partialorder %v894_v6, 0.0  ;;  %v1093_v7 = vand.u32 2147483648, %v894_v6 }
 0x1cb   :  { %v1927_v56 = vpop.eup %1926  ;;  %v3440_v57 = vmul.f32 %v800_v5, %v3376_v61  ;;  %v801_v16 = vadd.f32 1.0, %v769_v58  ;;  %v578_v12 = vmul.f32 1.5707964, %v546_v28  ;;  %vm1097_vm5 = vcmp.eq.f32.partialorder %v895_v8, inf }
 0x1cc   :  { %v1089_v50 = vmul.f32 %v1927_v56, %v894_v6  ;;  %vm1099_vm6 = vcmp.eq.f32.partialorder %v895_v8, 0.0  ;;  %v1100_v63 = vand.u32 2147483648, %v895_v8  ;;  %v1343_v40 = vshll.u32 %v1311_v54, 30 }
 0x1cd   :  { %v864_v44 = vmul.f32 %v3440_v57, %v3440_v57  ;;  %v3445_v32 = vmul.f32 %v801_v16, %v3393_v13  ;;  %v610_v49 = vmul.f32 %v578_v12, %v578_v12  ;;  %v1439_v30 = vshll.u32 %v1407_v31, 30 }
 0x1ce   :  { %v1929_v36 = vpop.eup %1928  ;;  %v1091_v47 = vsel %vm1090_vm3, %v894_v6, %v1089_v50  ;;  %v1855_v9 = vcvt.f32.s32 %v3360_v33  ;;  %v1858_v33 = vcvt.f32.s32 %v3371_v23 }
 0x1cf   :  { %v1094_v61 = vsel %vm1092_vm4, %v1093_v7, %v1091_v47  ;;  %v1096_v25 = vmul.f32 %v1929_v36, %v895_v8  ;;  %v896_v10 = vsub.f32 1.0, %v864_v44  ;;  %v865_v38 = vmul.f32 %v3445_v32, %v3445_v32 }
 0x1d0   :  { %v1246_v53 = vsel %vm3430_vm1, %v1094_v61, %v3388_v43  ;;  %v1278_v13 = vsel %vm3430_vm1, %v3388_v43, %v1094_v61  ;;  %v642_v62 = vmul.f32 -0.0001984127, %v610_v49  ;;  %v1376_v52 = vadd.s32 1, %v1855_v9 }
 0x1d1   :  { %v1502_v0 = vxor.u32 %v1342_v59, %v1246_v53  ;;  %v1598_v24 = vxor.u32 %v1438_v42, %v1278_v13  ;;  %v1098_v27 = vsel %vm1097_vm5, %v895_v8, %v1096_v25  ;;  %1930 = vrsqrt.f32 %v896_v10 }
 0x1d2   :  { %v1101_v6 = vsel %vm1099_vm6, %v1100_v63, %v1098_v27  ;;  %v897_v1 = vsub.f32 1.0, %v865_v38  ;;  %v674_v22 = vadd.f32 0.008333333, %v642_v62  ;;  %v1184_v14 = vand.u32 1, %v1855_v9 }
 0x1d3   :  { %1662 = vst [vmem:[#allocation2 + $0xd8] sm:$0xff] %v1502_v0  ;;  %1694 = vst [vmem:[#allocation4 + $0xd8] sm:$0xff] %v1598_v24  ;;  %v1247_v18 = vsel %vm3435_vm2, %v1101_v6, %v3407_v29  ;;  %v1279_v43 = vsel %vm3435_vm2, %v3407_v29, %v1101_v6  ;;  %v1312_v35 = vand.u32 2, %v1855_v9  ;;  %v1408_v41 = vand.u32 2, %v1376_v52 }
 0x1d4   :  { %v1503_v51 = vxor.u32 %v1343_v40, %v1247_v18  ;;  %v1599_v8 = vxor.u32 %v1439_v30, %v1279_v43  ;;  %1932 = vrsqrt.f32 %v897_v1  ;;  %v706_v48 = vmul.f32 %v674_v22, %v610_v49 }
 0x1d5   :  { %v1377_v45 = vadd.s32 1, %v1858_v33  ;;  %vm1104_vm7 = vcmp.eq.f32.partialorder %v896_v10, inf  ;;  %v1107_v55 = vand.u32 2147483648, %v896_v10  ;;  %vm3463_vm8 = vcmp.ne.s32.totalorder %v1184_v14, 0 }
 0x1d6   :  { %1663 = vst [vmem:[#allocation2 + $0xe0] sm:$0xff] %v1503_v51  ;;  %1695 = vst [vmem:[#allocation4 + $0xe0] sm:$0xff] %v1599_v8  ;;  %v738_v39 = vadd.f32 -0.16666667, %v706_v48  ;;  %v1344_v19 = vshll.u32 %v1312_v35, 30  ;;  %vm1106_vm9 = vcmp.eq.f32.partialorder %v896_v10, 0.0  ;;  %v1861_v47 = vcvt.f32.s32 %v3427_v20 }
 0x1d7   :  { %v1440_v34 = vshll.u32 %v1408_v41, 30  ;;  %v1185_v21 = vand.u32 1, %v1858_v33  ;;  %v1313_v11 = vand.u32 2, %v1858_v33  ;;  %v1409_v5 = vand.u32 2, %v1377_v45 }
 0x1d8   :  { %v770_v2 = vmul.f32 %v738_v39, %v610_v49  ;;  %vm1111_vm10 = vcmp.eq.f32.partialorder %v897_v1, inf  ;;  %v1114_v42 = vand.u32 2147483648, %v897_v1  ;;  %vm1113_vm11 = vcmp.eq.f32.partialorder %v897_v1, 0.0 }
 0x1d9   :  { %vm1217_vm12 = vcmp.ne.s32.totalorder %v1185_v21, 0  ;;  %v1345_v31 = vshll.u32 %v1313_v11, 30  ;;  %v1378_v49 = vadd.s32 1, %v1861_v47  ;;  %v1186_v25 = vand.u32 1, %v1861_v47 }
 0x1da   :  { %v802_v29 = vadd.f32 1.0, %v770_v2 }
 0x1db   :  { %v1931_v37 = vpop.eup %1930  ;;  %v1410_v38 = vand.u32 2, %v1378_v49  ;;  %vm1218_vm15 = vcmp.ne.s32.totalorder %v1186_v25, 0 }
 0x1dc   :  { %v1103_v3 = vmul.f32 %v1931_v37, %v896_v10  ;;  %v834_v23 = vmul.f32 %v802_v29, %v578_v12  ;;  %v1441_v12 = vshll.u32 %v1409_v5, 30 }
 0x1dd   :  { %v1442_v0 = vshll.u32 %v1410_v38, 30 }
 0x1de   :  { %v1105_v4 = vsel %vm1104_vm7, %v896_v10, %v1103_v3  ;;  %v1933_v26 = vpop.eup %1932  ;;  %v866_v54 = vmul.f32 %v834_v23, %v834_v23  ;;  %v1314_v10 = vand.u32 2, %v1861_v47 }
 0x1df   :  { %v1108_v46 = vsel %vm1106_vm9, %v1107_v55, %v1105_v4  ;;  %v1110_v59 = vmul.f32 %v1933_v26, %v897_v1 }
 0x1e0   :  { %v1248_v58 = vsel %vm3463_vm8, %v1108_v46, %v3440_v57  ;;  %v1280_v15 = vsel %vm3463_vm8, %v3440_v57, %v1108_v46  ;;  %v898_v16 = vsub.f32 1.0, %v866_v54  ;;  %v1346_v62 = vshll.u32 %v1314_v10, 30 }
 0x1e1   :  { %v1504_v28 = vxor.u32 %v1344_v19, %v1248_v58  ;;  %v1600_v56 = vxor.u32 %v1440_v34, %v1280_v15  ;;  %v1112_v17 = vsel %vm1111_vm10, %v897_v1, %v1110_v59 }
 0x1e2   :  { %v1115_v50 = vsel %vm1113_vm11, %v1114_v42, %v1112_v17  ;;  %1934 = vrsqrt.f32 %v898_v16  ;;  %vm1118_vm13 = vcmp.eq.f32.partialorder %v898_v16, inf  ;;  %v1121_v13 = vand.u32 2147483648, %v898_v16 }
 0x1e3   :  { %1664 = vst [vmem:[#allocation2 + $0xe8] sm:$0xff] %v1504_v28  ;;  %1696 = vst [vmem:[#allocation4 + $0xe8] sm:$0xff] %v1600_v56  ;;  %v1249_v7 = vsel %vm1217_vm12, %v1115_v50, %v3445_v32  ;;  %v1281_v44 = vsel %vm1217_vm12, %v3445_v32, %v1115_v50  ;;  %vm1120_vm14 = vcmp.eq.f32.partialorder %v898_v16, 0.0 }
 0x1e4   :  { %v1505_v57 = vxor.u32 %v1345_v31, %v1249_v7  ;;  %v1601_v36 = vxor.u32 %v1441_v12, %v1281_v44 }
 0x1e6   :  { %1665 = vst [vmem:[#allocation2 + $0xf0] sm:$0xff] %v1505_v57  ;;  %1697 = vst [vmem:[#allocation4 + $0xf0] sm:$0xff] %v1601_v36 }
 0x1ec   :  { %v1935_v61 = vpop.eup %1934 }
 0x1ed   :  { %v1117_v53 = vmul.f32 %v1935_v61, %v898_v16 }
 0x1ef   :  { %v1119_v63 = vsel %vm1118_vm13, %v898_v16, %v1117_v53 }
 0x1f0   :  { %v1122_v32 = vsel %vm1120_vm14, %v1121_v13, %v1119_v63 }
 0x1f1   :  { %v1250_v20 = vsel %vm1218_vm15, %v1122_v32, %v834_v23  ;;  %v1282_v24 = vsel %vm1218_vm15, %v834_v23, %v1122_v32 }
 0x1f2   :  { %v1506_v27 = vxor.u32 %v1346_v62, %v1250_v20  ;;  %v1602_v6 = vxor.u32 %v1442_v0, %v1282_v24 }
 0x1f4   :  { %1666 = vst [vmem:[#allocation2 + $0xf8] sm:$0xff] %v1506_v27  ;;  %1698 = vst [vmem:[#allocation4 + $0xf8] sm:$0xff] %v1602_v6 }
 0x1f5   :  { %1951 = shalt.err (!%p1948_p4)
}
 0x1f6   :  { %s1952_s19 = scalar_lea.hbm %s3510_s3, 4096 }
 0x1f7   :  { %p1953_p5 = scmp.ne.s32.totalorder %s3510_s3, %s1952_s19  ;;  %p1956_p6 = scmp.lt.u32.totalorder %s1952_s19, %s3510_s3 }
 0x1f9   :  { %p1958_p7 = pnand %p1956_p6, %p1953_p5 }
 0x1fb   :  { %1961 = shalt.err (!%p1958_p7)
}
 0x1fc   :  { %s1992_s24 = smov 128   ;;  %s1993_s25 = smov 8  }
 0x1fd   :  { %1710 = dma.vmem_to_hbm [thread:$0]  %s1705_s13, 4096, %s3510_s3, [#allocation3], %s1992_s24, %s1992_s24, %s1993_s25  }
 0x1fe   :  { %s1962_s27 = scalar_lea.vmem %s3476_s15, 4096  ;;  %p1967_p9 = scmp.lt.s32.totalorder %s3476_s15, %s3476_s15 }
 0x1ff   :  { %p1963_p8 = scmp.ne.s32.totalorder %s3476_s15, %s1962_s27  ;;  %p1968_p10 = scmp.lt.s32.totalorder %s1962_s27, %s1962_s27 }
 0x201   :  { %p1969_p11 = por %p1968_p10, %p1967_p9 }
 0x203   :  { %p1970_p12 = pnand %p1969_p11, %p1963_p8 }
 0x205   :  { %1973 = shalt.err (!%p1970_p12)
}
 0x206   :  { %s1974_s30 = scalar_lea.hbm %s3511_s4, 4096 }
 0x207   :  { %p1975_p13 = scmp.ne.s32.totalorder %s3511_s4, %s1974_s30  ;;  %p1978_p0 = scmp.lt.u32.totalorder %s1974_s30, %s3511_s4 }
 0x209   :  { %p1980_p1 = pnand %p1978_p0, %p1975_p13 }
 0x20b   :  { %1983 = shalt.err (!%p1980_p1)
}
 0x20c   :  { %1722 = dma.vmem_to_hbm [thread:$0]  %s3476_s15, 4096, %s3511_s4, [#allocation5], %s1992_s24, %s1992_s24, %s1993_s25  }
 0x20d   :  { %1984 = dma.done.wait [#allocation3], 4096  }
 0x20e   :  { %1985 = vsyncadd [#allocation3], 4294963200 }
 0x20f   :  { %1986 = dma.done.wait [#allocation5], 4096  }
 0x210   :  { %1987 = vsyncadd [#allocation5], 4294963200 }
 0x211   :  { %1729 = vsyncpa [#allocation3], 1 }
 0x212   :  { %1730 = vsyncpa [#allocation5], 1 }

</bundles_post_ra>
